<compile_context>
chip_gen: v7x
topology: tpu7x:2x2x1
jax: 0.10.0
libtpu: 0.0.40
codegen_flags: <defaults>
</compile_context>

<pallas_src>
import jax
import jax.numpy as jnp
import numpy as np
from jax.experimental import pallas as pl
from jax.experimental.pallas import tpu as pltpu

HIDDEN_THRESH = 0.3
OUTPUT_THRESH = 1.0e6  # inf_th for the nonfiring output layer


def _pick_time_chunk(win, max_chunk=32):
    """Timesteps per grid step: whole window if small, else a multiple-of-8 divisor."""
    if win <= max_chunk:
        return win
    for c in range(max_chunk, 7, -1):
        if win % c == 0 and c % 8 == 0:
            return c
    return win  # fallback: whole window in one chunk


def _snn_kernel(x_ref, w1_ref, w2_ref, w3_ref, a1_ref, a2_ref, a3_ref,
                omem_ref, ospk_ref,
                m1_ref, s1_ref, m2_ref, s2_ref, m3_ref, s3_ref):
    c = pl.program_id(0)

    # init_state(): mems / spikes start at zero before the time loop.
    @pl.when(c == 0)
    def _():
        for r in (m1_ref, s1_ref, m2_ref, s2_ref, m3_ref, s3_ref):
            r[...] = jnp.zeros(r.shape, r.dtype)

    B, t_chunk, _ = x_ref.shape
    H = m1_ref.shape[1]
    OP = m3_ref.shape[1]

    # Weights stay resident (constant index maps).  Hoist the alpha broadcasts
    # out of the per-timestep loop: done once per chunk, not once per step.
    w1 = w1_ref[...]
    w2 = w2_ref[...]
    w3 = w3_ref[...]
    a1 = jnp.broadcast_to(a1_ref[...], (B, H))
    a2 = jnp.broadcast_to(a2_ref[...], (B, H))
    a3 = jnp.broadcast_to(a3_ref[...], (B, OP))

    def layer_step(prev_spikes, mem, spk, w, alpha, thresh):
        # update_mem: mem = mem * alpha * (1 - o_spike) + linear(i_spike)
        cur = jnp.dot(prev_spikes, w, preferred_element_type=jnp.float32)
        mem = jnp.where(spk > 0.0, 0.0, mem * alpha) + cur
        # activation_function: o_spike = (mem - thresh > 0); mem = mem * (mem < thresh)
        new_spk = ((mem - thresh) > 0.0).astype(jnp.float32)
        mem = jnp.where(mem < thresh, mem, 0.0)
        return mem, new_spk

    # Load recurrent state once per chunk; carried in registers across steps.
    m1, s1 = m1_ref[...], s1_ref[...]
    m2, s2 = m2_ref[...], s2_ref[...]
    m3, s3 = m3_ref[...], s3_ref[...]

    # Fully unrolled in-kernel time loop (t_chunk is a small static int):
    # static indices everywhere; per-step output rows are written lane-dense
    # into the resident VMEM output block (one HBM writeback per chunk).
    for i in range(t_chunk):
        x = x_ref[:, i, :]                                   # (B, num_in) at step t
        m1, s1 = layer_step(x,  m1, s1, w1, a1, HIDDEN_THRESH)
        m2, s2 = layer_step(s1, m2, s2, w2, a2, HIDDEN_THRESH)
        m3, s3 = layer_step(s2, m3, s3, w3, a3, OUTPUT_THRESH)
        omem_ref[i] = m3                                     # all_o_mems[t]
        ospk_ref[i] = s3                                     # all_o_spikes[t]

    # Carry the recurrent state to the next time chunk.
    m1_ref[...], s1_ref[...] = m1, s1
    m2_ref[...], s2_ref[...] = m2, s2
    m3_ref[...], s3_ref[...] = m3, s3


def snn_forward(x_bt, w1, w2, w3, tau1, tau2, tau3, *, t_chunk=None):
    """x_bt: (batch, win, num_input) as in SNN.forward; weights are (in, out)."""
    B, win, N_in = x_bt.shape
    H = w1.shape[1]
    O = w3.shape[1]
    OP = max(128, ((O + 127) // 128) * 128)       # lane-dense padded output width

    if t_chunk is None:
        t_chunk = _pick_time_chunk(win)
    assert win % t_chunk == 0
    n_chunks = win // t_chunk

    x = x_bt.astype(jnp.float32)
    w1f = w1.astype(jnp.float32)
    w2f = w2.astype(jnp.float32)
    w3p = jnp.zeros((H, OP), jnp.float32).at[:, :O].set(w3.astype(jnp.float32))
    a1 = jax.nn.sigmoid(tau1).reshape(1, H).astype(jnp.float32)
    a2 = jax.nn.sigmoid(tau2).reshape(1, H).astype(jnp.float32)
    a3p = jnp.zeros((1, OP), jnp.float32).at[:, :O].set(
        jax.nn.sigmoid(tau3).reshape(1, O).astype(jnp.float32))

    omems_p, ospikes_p = pl.pallas_call(
        _snn_kernel,
        out_shape=(jax.ShapeDtypeStruct((win, B, OP), jnp.float32),
                   jax.ShapeDtypeStruct((win, B, OP), jnp.float32)),
        grid=(n_chunks,),
        in_specs=[
            pl.BlockSpec((B, t_chunk, N_in), lambda c: (0, c, 0)),  # input spikes chunk
            pl.BlockSpec((N_in, H), lambda c: (0, 0)),              # W layer 1 (resident)
            pl.BlockSpec((H, H),    lambda c: (0, 0)),              # W layer 2 (resident)
            pl.BlockSpec((H, OP),   lambda c: (0, 0)),              # W output, lane-padded
            pl.BlockSpec((1, H),    lambda c: (0, 0)),              # alpha l1
            pl.BlockSpec((1, H),    lambda c: (0, 0)),              # alpha l2
            pl.BlockSpec((1, OP),   lambda c: (0, 0)),              # alpha out (padded)
        ],
        out_specs=(
            pl.BlockSpec((t_chunk, B, OP), lambda c: (c, 0, 0)),    # all_o_mems (padded)
            pl.BlockSpec((t_chunk, B, OP), lambda c: (c, 0, 0)),    # all_o_spikes (padded)
        ),
        scratch_shapes=[
            pltpu.VMEM((B, H),  jnp.float32),   # mem   l1
            pltpu.VMEM((B, H),  jnp.float32),   # spike l1
            pltpu.VMEM((B, H),  jnp.float32),   # mem   l2
            pltpu.VMEM((B, H),  jnp.float32),   # spike l2
            pltpu.VMEM((B, OP), jnp.float32),   # mem   out
            pltpu.VMEM((B, OP), jnp.float32),   # spike out
        ],
        compiler_params=pltpu.CompilerParams(
            # Time chunks carry recurrent state -> must stay sequential.
            dimension_semantics=("arbitrary",)),
    )(x, w1f, w2f, w3p, a1, a2, a3p)

    # Slice away the lane padding (layout plumbing only).
    return omems_p[..., :O], ospikes_p[..., :O]


def snn_forward_ref(x_bt, w1, w2, w3, tau1, tau2, tau3):
    """Pure-JAX reference replicating the PyTorch forward step-by-step."""
    B, win, _ = x_bt.shape
    H = w1.shape[1]
    O = w3.shape[1]
    a1, a2, a3 = jax.nn.sigmoid(tau1), jax.nn.sigmoid(tau2), jax.nn.sigmoid(tau3)
    m1 = jnp.zeros((B, H)); s1 = jnp.zeros((B, H))
    m2 = jnp.zeros((B, H)); s2 = jnp.zeros((B, H))
    m3 = jnp.zeros((B, O)); s3 = jnp.zeros((B, O))
    omems, ospikes = [], []
    for t in range(win):
        prev = x_bt[:, t, :]
        def step(prev, w, a, m, s, th):
            mem = m * a * (1.0 - s) + prev @ w
            spk = ((mem - th) > 0).astype(jnp.float32)
            mem = mem * (mem < th).astype(jnp.float32)
            return mem, spk
        m1, s1 = step(prev, w1, a1, m1, s1, HIDDEN_THRESH)
        m2, s2 = step(s1,   w2, a2, m2, s2, HIDDEN_THRESH)
        m3, s3 = step(s2,   w3, a3, m3, s3, OUTPUT_THRESH)
        omems.append(m3); ospikes.append(s3)
    return jnp.stack(omems, 0), jnp.stack(ospikes, 0)


if __name__ == "__main__":
    # Small shapes consistent with the module: batch, win timesteps,
    # num_input features, H hidden, num_output classes.
    B, WIN, N_IN, H, O = 8, 8, 16, 32, 4
    TIME_MS, MEAN_TAU = 80.0, 20.0
    delta_t = TIME_MS / WIN

    key = jax.random.PRNGKey(0)
    kx, k1, k2, k3, kt1, kt2, kt3 = jax.random.split(key, 7)

    # Input "spikes" as floats (the module feeds images.float()).
    x = jax.random.uniform(kx, (B, WIN, N_IN), dtype=jnp.float32)
    x = (x > 0.5).astype(jnp.float32)

    # nn.Linear(in, out, bias=False) init: U(-1/sqrt(in), 1/sqrt(in)); stored as (in, out).
    def linear_w(k, n_in, n_out):
        b = 1.0 / np.sqrt(n_in)
        return jax.random.uniform(k, (n_in, n_out), minval=-b, maxval=b,
                                  dtype=jnp.float32)

    w1 = linear_w(k1, N_IN, H)
    w2 = linear_w(k2, H, H)
    w3 = linear_w(k3, H, O)

    # get_tau_m('normal'): tau ~ Normal(logit(exp(-delta_t / mean_tau)), 1)
    mean = float(np.log(np.exp(-delta_t / MEAN_TAU) / (1.0 - np.exp(-delta_t / MEAN_TAU))))
    tau1 = mean + jax.random.normal(kt1, (H,), dtype=jnp.float32)
    tau2 = mean + jax.random.normal(kt2, (H,), dtype=jnp.float32)
    tau3 = mean + jax.random.normal(kt3, (O,), dtype=jnp.float32)

    omems, ospikes = snn_forward(x, w1, w2, w3, tau1, tau2, tau3)
    jax.block_until_ready((omems, ospikes))

    ref_m, ref_s = snn_forward_ref(x, w1, w2, w3, tau1, tau2, tau3)
    np.testing.assert_allclose(np.asarray(omems), np.asarray(ref_m),
                               rtol=1e-5, atol=1e-5)
    np.testing.assert_allclose(np.asarray(ospikes), np.asarray(ref_s),
                               rtol=1e-5, atol=1e-5)

    print("KERNEL_OK")
</pallas_src>

<mosaic_0001>
module attributes {stable_mosaic.version = 11 : i64} {
  func.func @_snn_kernel(%arg0: i32, %arg1: memref<8x8x16xf32, #tpu.memory_space<vmem>>, %arg2: memref<16x32xf32, #tpu.memory_space<vmem>>, %arg3: memref<32x32xf32, #tpu.memory_space<vmem>>, %arg4: memref<32x128xf32, #tpu.memory_space<vmem>>, %arg5: memref<1x32xf32, #tpu.memory_space<vmem>>, %arg6: memref<1x32xf32, #tpu.memory_space<vmem>>, %arg7: memref<1x128xf32, #tpu.memory_space<vmem>>, %arg8: memref<8x8x128xf32, #tpu.memory_space<vmem>>, %arg9: memref<8x8x128xf32, #tpu.memory_space<vmem>>, %arg10: memref<8x32xf32, #tpu.memory_space<vmem>>, %arg11: memref<8x32xf32, #tpu.memory_space<vmem>>, %arg12: memref<8x32xf32, #tpu.memory_space<vmem>>, %arg13: memref<8x32xf32, #tpu.memory_space<vmem>>, %arg14: memref<8x128xf32, #tpu.memory_space<vmem>>, %arg15: memref<8x128xf32, #tpu.memory_space<vmem>>) attributes {dimension_semantics = [#tpu.dimension_semantics<arbitrary>], iteration_bounds = array<i64: 1>, scalar_prefetch = 0 : i64, scratch_operands = 6 : i64, tpu.core_type = #tpu.core_type<tc>, window_params = [{transform_indices = @transform_0, window_bounds = array<i64: 8, 8, 16>}, {pipeline_mode = #tpu.pipeline_mode<synchronous>, transform_indices = @transform_1, window_bounds = array<i64: 16, 32>}, {pipeline_mode = #tpu.pipeline_mode<synchronous>, transform_indices = @transform_2, window_bounds = array<i64: 32, 32>}, {pipeline_mode = #tpu.pipeline_mode<synchronous>, transform_indices = @transform_3, window_bounds = array<i64: 32, 128>}, {pipeline_mode = #tpu.pipeline_mode<synchronous>, transform_indices = @transform_4, window_bounds = array<i64: 1, 32>}, {pipeline_mode = #tpu.pipeline_mode<synchronous>, transform_indices = @transform_5, window_bounds = array<i64: 1, 32>}, {pipeline_mode = #tpu.pipeline_mode<synchronous>, transform_indices = @transform_6, window_bounds = array<i64: 1, 128>}, {transform_indices = @transform_7, window_bounds = array<i64: 8, 8, 128>}, {transform_indices = @transform_8, window_bounds = array<i64: 8, 8, 128>}]} {
    %c0_i32 = arith.constant 0 : i32
    %0 = arith.cmpi eq, %arg0, %c0_i32 : i32
    %1 = arith.extui %0 : i1 to i32
    %c0_i32_0 = arith.constant 0 : i32
    %2 = arith.cmpi ne, %1, %c0_i32_0 : i32
    scf.if %2 {
      %cst_268 = arith.constant 0.000000e+00 : f32
      %499 = vector.broadcast %cst_268 : f32 to vector<8x32xf32>
      %c0_269 = arith.constant 0 : index
      %c0_270 = arith.constant 0 : index
      %500 = vector.load %arg10[%c0_269, %c0_270] : memref<8x32xf32, #tpu.memory_space<vmem>>, vector<8x32xf32>
      tpu.vector_store %arg10[%c0_269, %c0_270], %499 {strides = array<i32>} : memref<8x32xf32, #tpu.memory_space<vmem>>, vector<8x32xf32>,
      %cst_271 = arith.constant 0.000000e+00 : f32
      %501 = vector.broadcast %cst_271 : f32 to vector<8x32xf32>
      %c0_272 = arith.constant 0 : index
      %c0_273 = arith.constant 0 : index
      %502 = vector.load %arg11[%c0_272, %c0_273] : memref<8x32xf32, #tpu.memory_space<vmem>>, vector<8x32xf32>
      tpu.vector_store %arg11[%c0_272, %c0_273], %501 {strides = array<i32>} : memref<8x32xf32, #tpu.memory_space<vmem>>, vector<8x32xf32>,
      %cst_274 = arith.constant 0.000000e+00 : f32
      %503 = vector.broadcast %cst_274 : f32 to vector<8x32xf32>
      %c0_275 = arith.constant 0 : index
      %c0_276 = arith.constant 0 : index
      %504 = vector.load %arg12[%c0_275, %c0_276] : memref<8x32xf32, #tpu.memory_space<vmem>>, vector<8x32xf32>
      tpu.vector_store %arg12[%c0_275, %c0_276], %503 {strides = array<i32>} : memref<8x32xf32, #tpu.memory_space<vmem>>, vector<8x32xf32>,
      %cst_277 = arith.constant 0.000000e+00 : f32
      %505 = vector.broadcast %cst_277 : f32 to vector<8x32xf32>
      %c0_278 = arith.constant 0 : index
      %c0_279 = arith.constant 0 : index
      %506 = vector.load %arg13[%c0_278, %c0_279] : memref<8x32xf32, #tpu.memory_space<vmem>>, vector<8x32xf32>
      tpu.vector_store %arg13[%c0_278, %c0_279], %505 {strides = array<i32>} : memref<8x32xf32, #tpu.memory_space<vmem>>, vector<8x32xf32>,
      %cst_280 = arith.constant 0.000000e+00 : f32
      %507 = vector.broadcast %cst_280 : f32 to vector<8x128xf32>
      %c0_281 = arith.constant 0 : index
      %c0_282 = arith.constant 0 : index
      %508 = vector.load %arg14[%c0_281, %c0_282] : memref<8x128xf32, #tpu.memory_space<vmem>>, vector<8x128xf32>
      tpu.vector_store %arg14[%c0_281, %c0_282], %507 {strides = array<i32>} : memref<8x128xf32, #tpu.memory_space<vmem>>, vector<8x128xf32>,
      %cst_283 = arith.constant 0.000000e+00 : f32
      %509 = vector.broadcast %cst_283 : f32 to vector<8x128xf32>
      %c0_284 = arith.constant 0 : index
      %c0_285 = arith.constant 0 : index
      %510 = vector.load %arg15[%c0_284, %c0_285] : memref<8x128xf32, #tpu.memory_space<vmem>>, vector<8x128xf32>
      tpu.vector_store %arg15[%c0_284, %c0_285], %509 {strides = array<i32>} : memref<8x128xf32, #tpu.memory_space<vmem>>, vector<8x128xf32>,
    } else {
    }
    %c0 = arith.constant 0 : index
    %c0_1 = arith.constant 0 : index
    %3 = vector.load %arg2[%c0, %c0_1] : memref<16x32xf32, #tpu.memory_space<vmem>>, vector<16x32xf32>
    %c0_2 = arith.constant 0 : index
    %c0_3 = arith.constant 0 : index
    %4 = vector.load %arg3[%c0_2, %c0_3] : memref<32x32xf32, #tpu.memory_space<vmem>>, vector<32x32xf32>
    %c0_4 = arith.constant 0 : index
    %c0_5 = arith.constant 0 : index
    %5 = vector.load %arg4[%c0_4, %c0_5] : memref<32x128xf32, #tpu.memory_space<vmem>>, vector<32x128xf32>
    %c0_6 = arith.constant 0 : index
    %c0_7 = arith.constant 0 : index
    %6 = vector.load %arg5[%c0_6, %c0_7] : memref<1x32xf32, #tpu.memory_space<vmem>>, vector<1x32xf32>
    %7 = vector.shape_cast %6 : vector<1x32xf32> to vector<1x32xf32>
    %8 = vector.broadcast %7 : vector<1x32xf32> to vector<8x32xf32>
    %c0_8 = arith.constant 0 : index
    %c0_9 = arith.constant 0 : index
    %9 = vector.load %arg6[%c0_8, %c0_9] : memref<1x32xf32, #tpu.memory_space<vmem>>, vector<1x32xf32>
    %10 = vector.shape_cast %9 : vector<1x32xf32> to vector<1x32xf32>
    %11 = vector.broadcast %10 : vector<1x32xf32> to vector<8x32xf32>
    %c0_10 = arith.constant 0 : index
    %c0_11 = arith.constant 0 : index
    %12 = vector.load %arg7[%c0_10, %c0_11] : memref<1x128xf32, #tpu.memory_space<vmem>>, vector<1x128xf32>
    %13 = vector.shape_cast %12 : vector<1x128xf32> to vector<1x128xf32>
    %14 = vector.broadcast %13 : vector<1x128xf32> to vector<8x128xf32>
    %c0_12 = arith.constant 0 : index
    %c0_13 = arith.constant 0 : index
    %15 = vector.load %arg10[%c0_12, %c0_13] : memref<8x32xf32, #tpu.memory_space<vmem>>, vector<8x32xf32>
    %c0_14 = arith.constant 0 : index
    %c0_15 = arith.constant 0 : index
    %16 = vector.load %arg11[%c0_14, %c0_15] : memref<8x32xf32, #tpu.memory_space<vmem>>, vector<8x32xf32>
    %c0_16 = arith.constant 0 : index
    %c0_17 = arith.constant 0 : index
    %17 = vector.load %arg12[%c0_16, %c0_17] : memref<8x32xf32, #tpu.memory_space<vmem>>, vector<8x32xf32>
    %c0_18 = arith.constant 0 : index
    %c0_19 = arith.constant 0 : index
    %18 = vector.load %arg13[%c0_18, %c0_19] : memref<8x32xf32, #tpu.memory_space<vmem>>, vector<8x32xf32>
    %c0_20 = arith.constant 0 : index
    %c0_21 = arith.constant 0 : index
    %19 = vector.load %arg14[%c0_20, %c0_21] : memref<8x128xf32, #tpu.memory_space<vmem>>, vector<8x128xf32>
    %c0_22 = arith.constant 0 : index
    %c0_23 = arith.constant 0 : index
    %20 = vector.load %arg15[%c0_22, %c0_23] : memref<8x128xf32, #tpu.memory_space<vmem>>, vector<8x128xf32>
    %c0_24 = arith.constant 0 : index
    %c0_25 = arith.constant 0 : index
    %c0_26 = arith.constant 0 : index
    %21 = vector.load %arg1[%c0_24, %c0_25, %c0_26] : memref<8x8x16xf32, #tpu.memory_space<vmem>>, vector<8x1x16xf32>
    %22 = vector.shape_cast %21 : vector<8x1x16xf32> to vector<8x16xf32>
    %cst = arith.constant dense<0.000000e+00> : vector<8x32xf32>
    %23 = tpu.matmul %22, %3, %cst {dimension_numbers = #tpu.dot_dimension_numbers<[1], [0], [0], [1], [0, 0, 1, 1], [], []>} : vector<8x16xf32>, vector<16x32xf32>, vector<8x32xf32> -> vector<8x32xf32>
    %cst_27 = arith.constant 0.000000e+00 : f32
    %24 = vector.broadcast %cst_27 : f32 to vector<8x32xf32>
    %25 = arith.cmpf ogt, %16, %24 : vector<8x32xf32>
    %26 = arith.mulf %15, %8 : vector<8x32xf32>
    %cst_28 = arith.constant 0.000000e+00 : f32
    %27 = vector.broadcast %cst_28 : f32 to vector<8x32xf32>
    %28 = arith.select %25, %27, %26 : vector<8x32xi1>, vector<8x32xf32>
    %29 = arith.addf %28, %23 : vector<8x32xf32>
    %cst_29 = arith.constant 3.000000e-01 : f32
    %30 = vector.broadcast %cst_29 : f32 to vector<8x32xf32>
    %31 = arith.subf %29, %30 : vector<8x32xf32>
    %cst_30 = arith.constant 0.000000e+00 : f32
    %32 = vector.broadcast %cst_30 : f32 to vector<8x32xf32>
    %33 = arith.cmpf ogt, %31, %32 : vector<8x32xf32>
    %34 = arith.extui %33 : vector<8x32xi1> to vector<8x32xi32>
    %35 = arith.sitofp %34 : vector<8x32xi32> to vector<8x32xf32>
    %cst_31 = arith.constant 3.000000e-01 : f32
    %36 = vector.broadcast %cst_31 : f32 to vector<8x32xf32>
    %37 = arith.cmpf olt, %29, %36 : vector<8x32xf32>
    %cst_32 = arith.constant 0.000000e+00 : f32
    %38 = vector.broadcast %cst_32 : f32 to vector<8x32xf32>
    %39 = arith.select %37, %29, %38 : vector<8x32xi1>, vector<8x32xf32>
    %cst_33 = arith.constant dense<0.000000e+00> : vector<8x32xf32>
    %40 = tpu.matmul %35, %4, %cst_33 {dimension_numbers = #tpu.dot_dimension_numbers<[1], [0], [0], [1], [0, 0, 1, 1], [], []>} : vector<8x32xf32>, vector<32x32xf32>, vector<8x32xf32> -> vector<8x32xf32>
    %cst_34 = arith.constant 0.000000e+00 : f32
    %41 = vector.broadcast %cst_34 : f32 to vector<8x32xf32>
    %42 = arith.cmpf ogt, %18, %41 : vector<8x32xf32>
    %43 = arith.mulf %17, %11 : vector<8x32xf32>
    %cst_35 = arith.constant 0.000000e+00 : f32
    %44 = vector.broadcast %cst_35 : f32 to vector<8x32xf32>
    %45 = arith.select %42, %44, %43 : vector<8x32xi1>, vector<8x32xf32>
    %46 = arith.addf %45, %40 : vector<8x32xf32>
    %cst_36 = arith.constant 3.000000e-01 : f32
    %47 = vector.broadcast %cst_36 : f32 to vector<8x32xf32>
    %48 = arith.subf %46, %47 : vector<8x32xf32>
    %cst_37 = arith.constant 0.000000e+00 : f32
    %49 = vector.broadcast %cst_37 : f32 to vector<8x32xf32>
    %50 = arith.cmpf ogt, %48, %49 : vector<8x32xf32>
    %51 = arith.extui %50 : vector<8x32xi1> to vector<8x32xi32>
    %52 = arith.sitofp %51 : vector<8x32xi32> to vector<8x32xf32>
    %cst_38 = arith.constant 3.000000e-01 : f32
    %53 = vector.broadcast %cst_38 : f32 to vector<8x32xf32>
    %54 = arith.cmpf olt, %46, %53 : vector<8x32xf32>
    %cst_39 = arith.constant 0.000000e+00 : f32
    %55 = vector.broadcast %cst_39 : f32 to vector<8x32xf32>
    %56 = arith.select %54, %46, %55 : vector<8x32xi1>, vector<8x32xf32>
    %cst_40 = arith.constant dense<0.000000e+00> : vector<8x128xf32>
    %57 = tpu.matmul %52, %5, %cst_40 {dimension_numbers = #tpu.dot_dimension_numbers<[1], [0], [0], [1], [0, 0, 1, 1], [], []>} : vector<8x32xf32>, vector<32x128xf32>, vector<8x128xf32> -> vector<8x128xf32>
    %cst_41 = arith.constant 0.000000e+00 : f32
    %58 = vector.broadcast %cst_41 : f32 to vector<8x128xf32>
    %59 = arith.cmpf ogt, %20, %58 : vector<8x128xf32>
    %60 = arith.mulf %19, %14 : vector<8x128xf32>
    %cst_42 = arith.constant 0.000000e+00 : f32
    %61 = vector.broadcast %cst_42 : f32 to vector<8x128xf32>
    %62 = arith.select %59, %61, %60 : vector<8x128xi1>, vector<8x128xf32>
    %63 = arith.addf %62, %57 : vector<8x128xf32>
    %cst_43 = arith.constant 1.000000e+06 : f32
    %64 = vector.broadcast %cst_43 : f32 to vector<8x128xf32>
    %65 = arith.subf %63, %64 : vector<8x128xf32>
    %cst_44 = arith.constant 0.000000e+00 : f32
    %66 = vector.broadcast %cst_44 : f32 to vector<8x128xf32>
    %67 = arith.cmpf ogt, %65, %66 : vector<8x128xf32>
    %68 = arith.extui %67 : vector<8x128xi1> to vector<8x128xi32>
    %69 = arith.sitofp %68 : vector<8x128xi32> to vector<8x128xf32>
    %cst_45 = arith.constant 1.000000e+06 : f32
    %70 = vector.broadcast %cst_45 : f32 to vector<8x128xf32>
    %71 = arith.cmpf olt, %63, %70 : vector<8x128xf32>
    %cst_46 = arith.constant 0.000000e+00 : f32
    %72 = vector.broadcast %cst_46 : f32 to vector<8x128xf32>
    %73 = arith.select %71, %63, %72 : vector<8x128xi1>, vector<8x128xf32>
    %c0_47 = arith.constant 0 : index
    %c0_48 = arith.constant 0 : index
    %c0_49 = arith.constant 0 : index
    %74 = vector.load %arg8[%c0_47, %c0_48, %c0_49] : memref<8x8x128xf32, #tpu.memory_space<vmem>>, vector<1x8x128xf32>
    %75 = vector.shape_cast %74 : vector<1x8x128xf32> to vector<8x128xf32>
    %76 = vector.shape_cast %73 : vector<8x128xf32> to vector<1x8x128xf32>
    tpu.vector_store %arg8[%c0_47, %c0_48, %c0_49], %76 {strides = array<i32>} : memref<8x8x128xf32, #tpu.memory_space<vmem>>, vector<1x8x128xf32>,
    %c0_50 = arith.constant 0 : index
    %c0_51 = arith.constant 0 : index
    %c0_52 = arith.constant 0 : index
    %77 = vector.load %arg9[%c0_50, %c0_51, %c0_52] : memref<8x8x128xf32, #tpu.memory_space<vmem>>, vector<1x8x128xf32>
    %78 = vector.shape_cast %77 : vector<1x8x128xf32> to vector<8x128xf32>
    %79 = vector.shape_cast %69 : vector<8x128xf32> to vector<1x8x128xf32>
    tpu.vector_store %arg9[%c0_50, %c0_51, %c0_52], %79 {strides = array<i32>} : memref<8x8x128xf32, #tpu.memory_space<vmem>>, vector<1x8x128xf32>,
    %c0_53 = arith.constant 0 : index
    %c1 = arith.constant 1 : index
    %c0_54 = arith.constant 0 : index
    %80 = vector.load %arg1[%c0_53, %c1, %c0_54] : memref<8x8x16xf32, #tpu.memory_space<vmem>>, vector<8x1x16xf32>
    %81 = vector.shape_cast %80 : vector<8x1x16xf32> to vector<8x16xf32>
    %cst_55 = arith.constant dense<0.000000e+00> : vector<8x32xf32>
    %82 = tpu.matmul %81, %3, %cst_55 {dimension_numbers = #tpu.dot_dimension_numbers<[1], [0], [0], [1], [0, 0, 1, 1], [], []>} : vector<8x16xf32>, vector<16x32xf32>, vector<8x32xf32> -> vector<8x32xf32>
    %cst_56 = arith.constant 0.000000e+00 : f32
    %83 = vector.broadcast %cst_56 : f32 to vector<8x32xf32>
    %84 = arith.cmpf ogt, %35, %83 : vector<8x32xf32>
    %85 = arith.mulf %39, %8 : vector<8x32xf32>
    %cst_57 = arith.constant 0.000000e+00 : f32
    %86 = vector.broadcast %cst_57 : f32 to vector<8x32xf32>
    %87 = arith.select %84, %86, %85 : vector<8x32xi1>, vector<8x32xf32>
    %88 = arith.addf %87, %82 : vector<8x32xf32>
    %cst_58 = arith.constant 3.000000e-01 : f32
    %89 = vector.broadcast %cst_58 : f32 to vector<8x32xf32>
    %90 = arith.subf %88, %89 : vector<8x32xf32>
    %cst_59 = arith.constant 0.000000e+00 : f32
    %91 = vector.broadcast %cst_59 : f32 to vector<8x32xf32>
    %92 = arith.cmpf ogt, %90, %91 : vector<8x32xf32>
    %93 = arith.extui %92 : vector<8x32xi1> to vector<8x32xi32>
    %94 = arith.sitofp %93 : vector<8x32xi32> to vector<8x32xf32>
    %cst_60 = arith.constant 3.000000e-01 : f32
    %95 = vector.broadcast %cst_60 : f32 to vector<8x32xf32>
    %96 = arith.cmpf olt, %88, %95 : vector<8x32xf32>
    %cst_61 = arith.constant 0.000000e+00 : f32
    %97 = vector.broadcast %cst_61 : f32 to vector<8x32xf32>
    %98 = arith.select %96, %88, %97 : vector<8x32xi1>, vector<8x32xf32>
    %cst_62 = arith.constant dense<0.000000e+00> : vector<8x32xf32>
    %99 = tpu.matmul %94, %4, %cst_62 {dimension_numbers = #tpu.dot_dimension_numbers<[1], [0], [0], [1], [0, 0, 1, 1], [], []>} : vector<8x32xf32>, vector<32x32xf32>, vector<8x32xf32> -> vector<8x32xf32>
    %cst_63 = arith.constant 0.000000e+00 : f32
    %100 = vector.broadcast %cst_63 : f32 to vector<8x32xf32>
    %101 = arith.cmpf ogt, %52, %100 : vector<8x32xf32>
    %102 = arith.mulf %56, %11 : vector<8x32xf32>
    %cst_64 = arith.constant 0.000000e+00 : f32
    %103 = vector.broadcast %cst_64 : f32 to vector<8x32xf32>
    %104 = arith.select %101, %103, %102 : vector<8x32xi1>, vector<8x32xf32>
    %105 = arith.addf %104, %99 : vector<8x32xf32>
    %cst_65 = arith.constant 3.000000e-01 : f32
    %106 = vector.broadcast %cst_65 : f32 to vector<8x32xf32>
    %107 = arith.subf %105, %106 : vector<8x32xf32>
    %cst_66 = arith.constant 0.000000e+00 : f32
    %108 = vector.broadcast %cst_66 : f32 to vector<8x32xf32>
    %109 = arith.cmpf ogt, %107, %108 : vector<8x32xf32>
    %110 = arith.extui %109 : vector<8x32xi1> to vector<8x32xi32>
    %111 = arith.sitofp %110 : vector<8x32xi32> to vector<8x32xf32>
    %cst_67 = arith.constant 3.000000e-01 : f32
    %112 = vector.broadcast %cst_67 : f32 to vector<8x32xf32>
    %113 = arith.cmpf olt, %105, %112 : vector<8x32xf32>
    %cst_68 = arith.constant 0.000000e+00 : f32
    %114 = vector.broadcast %cst_68 : f32 to vector<8x32xf32>
    %115 = arith.select %113, %105, %114 : vector<8x32xi1>, vector<8x32xf32>
    %cst_69 = arith.constant dense<0.000000e+00> : vector<8x128xf32>
    %116 = tpu.matmul %111, %5, %cst_69 {dimension_numbers = #tpu.dot_dimension_numbers<[1], [0], [0], [1], [0, 0, 1, 1], [], []>} : vector<8x32xf32>, vector<32x128xf32>, vector<8x128xf32> -> vector<8x128xf32>
    %cst_70 = arith.constant 0.000000e+00 : f32
    %117 = vector.broadcast %cst_70 : f32 to vector<8x128xf32>
    %118 = arith.cmpf ogt, %69, %117 : vector<8x128xf32>
    %119 = arith.mulf %73, %14 : vector<8x128xf32>
    %cst_71 = arith.constant 0.000000e+00 : f32
    %120 = vector.broadcast %cst_71 : f32 to vector<8x128xf32>
    %121 = arith.select %118, %120, %119 : vector<8x128xi1>, vector<8x128xf32>
    %122 = arith.addf %121, %116 : vector<8x128xf32>
    %cst_72 = arith.constant 1.000000e+06 : f32
    %123 = vector.broadcast %cst_72 : f32 to vector<8x128xf32>
    %124 = arith.subf %122, %123 : vector<8x128xf32>
    %cst_73 = arith.constant 0.000000e+00 : f32
    %125 = vector.broadcast %cst_73 : f32 to vector<8x128xf32>
    %126 = arith.cmpf ogt, %124, %125 : vector<8x128xf32>
    %127 = arith.extui %126 : vector<8x128xi1> to vector<8x128xi32>
    %128 = arith.sitofp %127 : vector<8x128xi32> to vector<8x128xf32>
    %cst_74 = arith.constant 1.000000e+06 : f32
    %129 = vector.broadcast %cst_74 : f32 to vector<8x128xf32>
    %130 = arith.cmpf olt, %122, %129 : vector<8x128xf32>
    %cst_75 = arith.constant 0.000000e+00 : f32
    %131 = vector.broadcast %cst_75 : f32 to vector<8x128xf32>
    %132 = arith.select %130, %122, %131 : vector<8x128xi1>, vector<8x128xf32>
    %c1_76 = arith.constant 1 : index
    %c0_77 = arith.constant 0 : index
    %c0_78 = arith.constant 0 : index
    %133 = vector.load %arg8[%c1_76, %c0_77, %c0_78] : memref<8x8x128xf32, #tpu.memory_space<vmem>>, vector<1x8x128xf32>
    %134 = vector.shape_cast %133 : vector<1x8x128xf32> to vector<8x128xf32>
    %135 = vector.shape_cast %132 : vector<8x128xf32> to vector<1x8x128xf32>
    tpu.vector_store %arg8[%c1_76, %c0_77, %c0_78], %135 {strides = array<i32>} : memref<8x8x128xf32, #tpu.memory_space<vmem>>, vector<1x8x128xf32>,
    %c1_79 = arith.constant 1 : index
    %c0_80 = arith.constant 0 : index
    %c0_81 = arith.constant 0 : index
    %136 = vector.load %arg9[%c1_79, %c0_80, %c0_81] : memref<8x8x128xf32, #tpu.memory_space<vmem>>, vector<1x8x128xf32>
    %137 = vector.shape_cast %136 : vector<1x8x128xf32> to vector<8x128xf32>
    %138 = vector.shape_cast %128 : vector<8x128xf32> to vector<1x8x128xf32>
    tpu.vector_store %arg9[%c1_79, %c0_80, %c0_81], %138 {strides = array<i32>} : memref<8x8x128xf32, #tpu.memory_space<vmem>>, vector<1x8x128xf32>,
    %c0_82 = arith.constant 0 : index
    %c2 = arith.constant 2 : index
    %c0_83 = arith.constant 0 : index
    %139 = vector.load %arg1[%c0_82, %c2, %c0_83] : memref<8x8x16xf32, #tpu.memory_space<vmem>>, vector<8x1x16xf32>
    %140 = vector.shape_cast %139 : vector<8x1x16xf32> to vector<8x16xf32>
    %cst_84 = arith.constant dense<0.000000e+00> : vector<8x32xf32>
    %141 = tpu.matmul %140, %3, %cst_84 {dimension_numbers = #tpu.dot_dimension_numbers<[1], [0], [0], [1], [0, 0, 1, 1], [], []>} : vector<8x16xf32>, vector<16x32xf32>, vector<8x32xf32> -> vector<8x32xf32>
    %cst_85 = arith.constant 0.000000e+00 : f32
    %142 = vector.broadcast %cst_85 : f32 to vector<8x32xf32>
    %143 = arith.cmpf ogt, %94, %142 : vector<8x32xf32>
    %144 = arith.mulf %98, %8 : vector<8x32xf32>
    %cst_86 = arith.constant 0.000000e+00 : f32
    %145 = vector.broadcast %cst_86 : f32 to vector<8x32xf32>
    %146 = arith.select %143, %145, %144 : vector<8x32xi1>, vector<8x32xf32>
    %147 = arith.addf %146, %141 : vector<8x32xf32>
    %cst_87 = arith.constant 3.000000e-01 : f32
    %148 = vector.broadcast %cst_87 : f32 to vector<8x32xf32>
    %149 = arith.subf %147, %148 : vector<8x32xf32>
    %cst_88 = arith.constant 0.000000e+00 : f32
    %150 = vector.broadcast %cst_88 : f32 to vector<8x32xf32>
    %151 = arith.cmpf ogt, %149, %150 : vector<8x32xf32>
    %152 = arith.extui %151 : vector<8x32xi1> to vector<8x32xi32>
    %153 = arith.sitofp %152 : vector<8x32xi32> to vector<8x32xf32>
    %cst_89 = arith.constant 3.000000e-01 : f32
    %154 = vector.broadcast %cst_89 : f32 to vector<8x32xf32>
    %155 = arith.cmpf olt, %147, %154 : vector<8x32xf32>
    %cst_90 = arith.constant 0.000000e+00 : f32
    %156 = vector.broadcast %cst_90 : f32 to vector<8x32xf32>
    %157 = arith.select %155, %147, %156 : vector<8x32xi1>, vector<8x32xf32>
    %cst_91 = arith.constant dense<0.000000e+00> : vector<8x32xf32>
    %158 = tpu.matmul %153, %4, %cst_91 {dimension_numbers = #tpu.dot_dimension_numbers<[1], [0], [0], [1], [0, 0, 1, 1], [], []>} : vector<8x32xf32>, vector<32x32xf32>, vector<8x32xf32> -> vector<8x32xf32>
    %cst_92 = arith.constant 0.000000e+00 : f32
    %159 = vector.broadcast %cst_92 : f32 to vector<8x32xf32>
    %160 = arith.cmpf ogt, %111, %159 : vector<8x32xf32>
    %161 = arith.mulf %115, %11 : vector<8x32xf32>
    %cst_93 = arith.constant 0.000000e+00 : f32
    %162 = vector.broadcast %cst_93 : f32 to vector<8x32xf32>
    %163 = arith.select %160, %162, %161 : vector<8x32xi1>, vector<8x32xf32>
    %164 = arith.addf %163, %158 : vector<8x32xf32>
    %cst_94 = arith.constant 3.000000e-01 : f32
    %165 = vector.broadcast %cst_94 : f32 to vector<8x32xf32>
    %166 = arith.subf %164, %165 : vector<8x32xf32>
    %cst_95 = arith.constant 0.000000e+00 : f32
    %167 = vector.broadcast %cst_95 : f32 to vector<8x32xf32>
    %168 = arith.cmpf ogt, %166, %167 : vector<8x32xf32>
    %169 = arith.extui %168 : vector<8x32xi1> to vector<8x32xi32>
    %170 = arith.sitofp %169 : vector<8x32xi32> to vector<8x32xf32>
    %cst_96 = arith.constant 3.000000e-01 : f32
    %171 = vector.broadcast %cst_96 : f32 to vector<8x32xf32>
    %172 = arith.cmpf olt, %164, %171 : vector<8x32xf32>
    %cst_97 = arith.constant 0.000000e+00 : f32
    %173 = vector.broadcast %cst_97 : f32 to vector<8x32xf32>
    %174 = arith.select %172, %164, %173 : vector<8x32xi1>, vector<8x32xf32>
    %cst_98 = arith.constant dense<0.000000e+00> : vector<8x128xf32>
    %175 = tpu.matmul %170, %5, %cst_98 {dimension_numbers = #tpu.dot_dimension_numbers<[1], [0], [0], [1], [0, 0, 1, 1], [], []>} : vector<8x32xf32>, vector<32x128xf32>, vector<8x128xf32> -> vector<8x128xf32>
    %cst_99 = arith.constant 0.000000e+00 : f32
    %176 = vector.broadcast %cst_99 : f32 to vector<8x128xf32>
    %177 = arith.cmpf ogt, %128, %176 : vector<8x128xf32>
    %178 = arith.mulf %132, %14 : vector<8x128xf32>
    %cst_100 = arith.constant 0.000000e+00 : f32
    %179 = vector.broadcast %cst_100 : f32 to vector<8x128xf32>
    %180 = arith.select %177, %179, %178 : vector<8x128xi1>, vector<8x128xf32>
    %181 = arith.addf %180, %175 : vector<8x128xf32>
    %cst_101 = arith.constant 1.000000e+06 : f32
    %182 = vector.broadcast %cst_101 : f32 to vector<8x128xf32>
    %183 = arith.subf %181, %182 : vector<8x128xf32>
    %cst_102 = arith.constant 0.000000e+00 : f32
    %184 = vector.broadcast %cst_102 : f32 to vector<8x128xf32>
    %185 = arith.cmpf ogt, %183, %184 : vector<8x128xf32>
    %186 = arith.extui %185 : vector<8x128xi1> to vector<8x128xi32>
    %187 = arith.sitofp %186 : vector<8x128xi32> to vector<8x128xf32>
    %cst_103 = arith.constant 1.000000e+06 : f32
    %188 = vector.broadcast %cst_103 : f32 to vector<8x128xf32>
    %189 = arith.cmpf olt, %181, %188 : vector<8x128xf32>
    %cst_104 = arith.constant 0.000000e+00 : f32
    %190 = vector.broadcast %cst_104 : f32 to vector<8x128xf32>
    %191 = arith.select %189, %181, %190 : vector<8x128xi1>, vector<8x128xf32>
    %c2_105 = arith.constant 2 : index
    %c0_106 = arith.constant 0 : index
    %c0_107 = arith.constant 0 : index
    %192 = vector.load %arg8[%c2_105, %c0_106, %c0_107] : memref<8x8x128xf32, #tpu.memory_space<vmem>>, vector<1x8x128xf32>
    %193 = vector.shape_cast %192 : vector<1x8x128xf32> to vector<8x128xf32>
    %194 = vector.shape_cast %191 : vector<8x128xf32> to vector<1x8x128xf32>
    tpu.vector_store %arg8[%c2_105, %c0_106, %c0_107], %194 {strides = array<i32>} : memref<8x8x128xf32, #tpu.memory_space<vmem>>, vector<1x8x128xf32>,
    %c2_108 = arith.constant 2 : index
    %c0_109 = arith.constant 0 : index
    %c0_110 = arith.constant 0 : index
    %195 = vector.load %arg9[%c2_108, %c0_109, %c0_110] : memref<8x8x128xf32, #tpu.memory_space<vmem>>, vector<1x8x128xf32>
    %196 = vector.shape_cast %195 : vector<1x8x128xf32> to vector<8x128xf32>
    %197 = vector.shape_cast %187 : vector<8x128xf32> to vector<1x8x128xf32>
    tpu.vector_store %arg9[%c2_108, %c0_109, %c0_110], %197 {strides = array<i32>} : memref<8x8x128xf32, #tpu.memory_space<vmem>>, vector<1x8x128xf32>,
    %c0_111 = arith.constant 0 : index
    %c3 = arith.constant 3 : index
    %c0_112 = arith.constant 0 : index
    %198 = vector.load %arg1[%c0_111, %c3, %c0_112] : memref<8x8x16xf32, #tpu.memory_space<vmem>>, vector<8x1x16xf32>
    %199 = vector.shape_cast %198 : vector<8x1x16xf32> to vector<8x16xf32>
    %cst_113 = arith.constant dense<0.000000e+00> : vector<8x32xf32>
    %200 = tpu.matmul %199, %3, %cst_113 {dimension_numbers = #tpu.dot_dimension_numbers<[1], [0], [0], [1], [0, 0, 1, 1], [], []>} : vector<8x16xf32>, vector<16x32xf32>, vector<8x32xf32> -> vector<8x32xf32>
    %cst_114 = arith.constant 0.000000e+00 : f32
    %201 = vector.broadcast %cst_114 : f32 to vector<8x32xf32>
    %202 = arith.cmpf ogt, %153, %201 : vector<8x32xf32>
    %203 = arith.mulf %157, %8 : vector<8x32xf32>
    %cst_115 = arith.constant 0.000000e+00 : f32
    %204 = vector.broadcast %cst_115 : f32 to vector<8x32xf32>
    %205 = arith.select %202, %204, %203 : vector<8x32xi1>, vector<8x32xf32>
    %206 = arith.addf %205, %200 : vector<8x32xf32>
    %cst_116 = arith.constant 3.000000e-01 : f32
    %207 = vector.broadcast %cst_116 : f32 to vector<8x32xf32>
    %208 = arith.subf %206, %207 : vector<8x32xf32>
    %cst_117 = arith.constant 0.000000e+00 : f32
    %209 = vector.broadcast %cst_117 : f32 to vector<8x32xf32>
    %210 = arith.cmpf ogt, %208, %209 : vector<8x32xf32>
    %211 = arith.extui %210 : vector<8x32xi1> to vector<8x32xi32>
    %212 = arith.sitofp %211 : vector<8x32xi32> to vector<8x32xf32>
    %cst_118 = arith.constant 3.000000e-01 : f32
    %213 = vector.broadcast %cst_118 : f32 to vector<8x32xf32>
    %214 = arith.cmpf olt, %206, %213 : vector<8x32xf32>
    %cst_119 = arith.constant 0.000000e+00 : f32
    %215 = vector.broadcast %cst_119 : f32 to vector<8x32xf32>
    %216 = arith.select %214, %206, %215 : vector<8x32xi1>, vector<8x32xf32>
    %cst_120 = arith.constant dense<0.000000e+00> : vector<8x32xf32>
    %217 = tpu.matmul %212, %4, %cst_120 {dimension_numbers = #tpu.dot_dimension_numbers<[1], [0], [0], [1], [0, 0, 1, 1], [], []>} : vector<8x32xf32>, vector<32x32xf32>, vector<8x32xf32> -> vector<8x32xf32>
    %cst_121 = arith.constant 0.000000e+00 : f32
    %218 = vector.broadcast %cst_121 : f32 to vector<8x32xf32>
    %219 = arith.cmpf ogt, %170, %218 : vector<8x32xf32>
    %220 = arith.mulf %174, %11 : vector<8x32xf32>
    %cst_122 = arith.constant 0.000000e+00 : f32
    %221 = vector.broadcast %cst_122 : f32 to vector<8x32xf32>
    %222 = arith.select %219, %221, %220 : vector<8x32xi1>, vector<8x32xf32>
    %223 = arith.addf %222, %217 : vector<8x32xf32>
    %cst_123 = arith.constant 3.000000e-01 : f32
    %224 = vector.broadcast %cst_123 : f32 to vector<8x32xf32>
    %225 = arith.subf %223, %224 : vector<8x32xf32>
    %cst_124 = arith.constant 0.000000e+00 : f32
    %226 = vector.broadcast %cst_124 : f32 to vector<8x32xf32>
    %227 = arith.cmpf ogt, %225, %226 : vector<8x32xf32>
    %228 = arith.extui %227 : vector<8x32xi1> to vector<8x32xi32>
    %229 = arith.sitofp %228 : vector<8x32xi32> to vector<8x32xf32>
    %cst_125 = arith.constant 3.000000e-01 : f32
    %230 = vector.broadcast %cst_125 : f32 to vector<8x32xf32>
    %231 = arith.cmpf olt, %223, %230 : vector<8x32xf32>
    %cst_126 = arith.constant 0.000000e+00 : f32
    %232 = vector.broadcast %cst_126 : f32 to vector<8x32xf32>
    %233 = arith.select %231, %223, %232 : vector<8x32xi1>, vector<8x32xf32>
    %cst_127 = arith.constant dense<0.000000e+00> : vector<8x128xf32>
    %234 = tpu.matmul %229, %5, %cst_127 {dimension_numbers = #tpu.dot_dimension_numbers<[1], [0], [0], [1], [0, 0, 1, 1], [], []>} : vector<8x32xf32>, vector<32x128xf32>, vector<8x128xf32> -> vector<8x128xf32>
    %cst_128 = arith.constant 0.000000e+00 : f32
    %235 = vector.broadcast %cst_128 : f32 to vector<8x128xf32>
    %236 = arith.cmpf ogt, %187, %235 : vector<8x128xf32>
    %237 = arith.mulf %191, %14 : vector<8x128xf32>
    %cst_129 = arith.constant 0.000000e+00 : f32
    %238 = vector.broadcast %cst_129 : f32 to vector<8x128xf32>
    %239 = arith.select %236, %238, %237 : vector<8x128xi1>, vector<8x128xf32>
    %240 = arith.addf %239, %234 : vector<8x128xf32>
    %cst_130 = arith.constant 1.000000e+06 : f32
    %241 = vector.broadcast %cst_130 : f32 to vector<8x128xf32>
    %242 = arith.subf %240, %241 : vector<8x128xf32>
    %cst_131 = arith.constant 0.000000e+00 : f32
    %243 = vector.broadcast %cst_131 : f32 to vector<8x128xf32>
    %244 = arith.cmpf ogt, %242, %243 : vector<8x128xf32>
    %245 = arith.extui %244 : vector<8x128xi1> to vector<8x128xi32>
    %246 = arith.sitofp %245 : vector<8x128xi32> to vector<8x128xf32>
    %cst_132 = arith.constant 1.000000e+06 : f32
    %247 = vector.broadcast %cst_132 : f32 to vector<8x128xf32>
    %248 = arith.cmpf olt, %240, %247 : vector<8x128xf32>
    %cst_133 = arith.constant 0.000000e+00 : f32
    %249 = vector.broadcast %cst_133 : f32 to vector<8x128xf32>
    %250 = arith.select %248, %240, %249 : vector<8x128xi1>, vector<8x128xf32>
    %c3_134 = arith.constant 3 : index
    %c0_135 = arith.constant 0 : index
    %c0_136 = arith.constant 0 : index
    %251 = vector.load %arg8[%c3_134, %c0_135, %c0_136] : memref<8x8x128xf32, #tpu.memory_space<vmem>>, vector<1x8x128xf32>
    %252 = vector.shape_cast %251 : vector<1x8x128xf32> to vector<8x128xf32>
    %253 = vector.shape_cast %250 : vector<8x128xf32> to vector<1x8x128xf32>
    tpu.vector_store %arg8[%c3_134, %c0_135, %c0_136], %253 {strides = array<i32>} : memref<8x8x128xf32, #tpu.memory_space<vmem>>, vector<1x8x128xf32>,
    %c3_137 = arith.constant 3 : index
    %c0_138 = arith.constant 0 : index
    %c0_139 = arith.constant 0 : index
    %254 = vector.load %arg9[%c3_137, %c0_138, %c0_139] : memref<8x8x128xf32, #tpu.memory_space<vmem>>, vector<1x8x128xf32>
    %255 = vector.shape_cast %254 : vector<1x8x128xf32> to vector<8x128xf32>
    %256 = vector.shape_cast %246 : vector<8x128xf32> to vector<1x8x128xf32>
    tpu.vector_store %arg9[%c3_137, %c0_138, %c0_139], %256 {strides = array<i32>} : memref<8x8x128xf32, #tpu.memory_space<vmem>>, vector<1x8x128xf32>,
    %c0_140 = arith.constant 0 : index
    %c4 = arith.constant 4 : index
    %c0_141 = arith.constant 0 : index
    %257 = vector.load %arg1[%c0_140, %c4, %c0_141] : memref<8x8x16xf32, #tpu.memory_space<vmem>>, vector<8x1x16xf32>
    %258 = vector.shape_cast %257 : vector<8x1x16xf32> to vector<8x16xf32>
    %cst_142 = arith.constant dense<0.000000e+00> : vector<8x32xf32>
    %259 = tpu.matmul %258, %3, %cst_142 {dimension_numbers = #tpu.dot_dimension_numbers<[1], [0], [0], [1], [0, 0, 1, 1], [], []>} : vector<8x16xf32>, vector<16x32xf32>, vector<8x32xf32> -> vector<8x32xf32>
    %cst_143 = arith.constant 0.000000e+00 : f32
    %260 = vector.broadcast %cst_143 : f32 to vector<8x32xf32>
    %261 = arith.cmpf ogt, %212, %260 : vector<8x32xf32>
    %262 = arith.mulf %216, %8 : vector<8x32xf32>
    %cst_144 = arith.constant 0.000000e+00 : f32
    %263 = vector.broadcast %cst_144 : f32 to vector<8x32xf32>
    %264 = arith.select %261, %263, %262 : vector<8x32xi1>, vector<8x32xf32>
    %265 = arith.addf %264, %259 : vector<8x32xf32>
    %cst_145 = arith.constant 3.000000e-01 : f32
    %266 = vector.broadcast %cst_145 : f32 to vector<8x32xf32>
    %267 = arith.subf %265, %266 : vector<8x32xf32>
    %cst_146 = arith.constant 0.000000e+00 : f32
    %268 = vector.broadcast %cst_146 : f32 to vector<8x32xf32>
    %269 = arith.cmpf ogt, %267, %268 : vector<8x32xf32>
    %270 = arith.extui %269 : vector<8x32xi1> to vector<8x32xi32>
    %271 = arith.sitofp %270 : vector<8x32xi32> to vector<8x32xf32>
    %cst_147 = arith.constant 3.000000e-01 : f32
    %272 = vector.broadcast %cst_147 : f32 to vector<8x32xf32>
    %273 = arith.cmpf olt, %265, %272 : vector<8x32xf32>
    %cst_148 = arith.constant 0.000000e+00 : f32
    %274 = vector.broadcast %cst_148 : f32 to vector<8x32xf32>
    %275 = arith.select %273, %265, %274 : vector<8x32xi1>, vector<8x32xf32>
    %cst_149 = arith.constant dense<0.000000e+00> : vector<8x32xf32>
    %276 = tpu.matmul %271, %4, %cst_149 {dimension_numbers = #tpu.dot_dimension_numbers<[1], [0], [0], [1], [0, 0, 1, 1], [], []>} : vector<8x32xf32>, vector<32x32xf32>, vector<8x32xf32> -> vector<8x32xf32>
    %cst_150 = arith.constant 0.000000e+00 : f32
    %277 = vector.broadcast %cst_150 : f32 to vector<8x32xf32>
    %278 = arith.cmpf ogt, %229, %277 : vector<8x32xf32>
    %279 = arith.mulf %233, %11 : vector<8x32xf32>
    %cst_151 = arith.constant 0.000000e+00 : f32
    %280 = vector.broadcast %cst_151 : f32 to vector<8x32xf32>
    %281 = arith.select %278, %280, %279 : vector<8x32xi1>, vector<8x32xf32>
    %282 = arith.addf %281, %276 : vector<8x32xf32>
    %cst_152 = arith.constant 3.000000e-01 : f32
    %283 = vector.broadcast %cst_152 : f32 to vector<8x32xf32>
    %284 = arith.subf %282, %283 : vector<8x32xf32>
    %cst_153 = arith.constant 0.000000e+00 : f32
    %285 = vector.broadcast %cst_153 : f32 to vector<8x32xf32>
    %286 = arith.cmpf ogt, %284, %285 : vector<8x32xf32>
    %287 = arith.extui %286 : vector<8x32xi1> to vector<8x32xi32>
    %288 = arith.sitofp %287 : vector<8x32xi32> to vector<8x32xf32>
    %cst_154 = arith.constant 3.000000e-01 : f32
    %289 = vector.broadcast %cst_154 : f32 to vector<8x32xf32>
    %290 = arith.cmpf olt, %282, %289 : vector<8x32xf32>
    %cst_155 = arith.constant 0.000000e+00 : f32
    %291 = vector.broadcast %cst_155 : f32 to vector<8x32xf32>
    %292 = arith.select %290, %282, %291 : vector<8x32xi1>, vector<8x32xf32>
    %cst_156 = arith.constant dense<0.000000e+00> : vector<8x128xf32>
    %293 = tpu.matmul %288, %5, %cst_156 {dimension_numbers = #tpu.dot_dimension_numbers<[1], [0], [0], [1], [0, 0, 1, 1], [], []>} : vector<8x32xf32>, vector<32x128xf32>, vector<8x128xf32> -> vector<8x128xf32>
    %cst_157 = arith.constant 0.000000e+00 : f32
    %294 = vector.broadcast %cst_157 : f32 to vector<8x128xf32>
    %295 = arith.cmpf ogt, %246, %294 : vector<8x128xf32>
    %296 = arith.mulf %250, %14 : vector<8x128xf32>
    %cst_158 = arith.constant 0.000000e+00 : f32
    %297 = vector.broadcast %cst_158 : f32 to vector<8x128xf32>
    %298 = arith.select %295, %297, %296 : vector<8x128xi1>, vector<8x128xf32>
    %299 = arith.addf %298, %293 : vector<8x128xf32>
    %cst_159 = arith.constant 1.000000e+06 : f32
    %300 = vector.broadcast %cst_159 : f32 to vector<8x128xf32>
    %301 = arith.subf %299, %300 : vector<8x128xf32>
    %cst_160 = arith.constant 0.000000e+00 : f32
    %302 = vector.broadcast %cst_160 : f32 to vector<8x128xf32>
    %303 = arith.cmpf ogt, %301, %302 : vector<8x128xf32>
    %304 = arith.extui %303 : vector<8x128xi1> to vector<8x128xi32>
    %305 = arith.sitofp %304 : vector<8x128xi32> to vector<8x128xf32>
    %cst_161 = arith.constant 1.000000e+06 : f32
    %306 = vector.broadcast %cst_161 : f32 to vector<8x128xf32>
    %307 = arith.cmpf olt, %299, %306 : vector<8x128xf32>
    %cst_162 = arith.constant 0.000000e+00 : f32
    %308 = vector.broadcast %cst_162 : f32 to vector<8x128xf32>
    %309 = arith.select %307, %299, %308 : vector<8x128xi1>, vector<8x128xf32>
    %c4_163 = arith.constant 4 : index
    %c0_164 = arith.constant 0 : index
    %c0_165 = arith.constant 0 : index
    %310 = vector.load %arg8[%c4_163, %c0_164, %c0_165] : memref<8x8x128xf32, #tpu.memory_space<vmem>>, vector<1x8x128xf32>
    %311 = vector.shape_cast %310 : vector<1x8x128xf32> to vector<8x128xf32>
    %312 = vector.shape_cast %309 : vector<8x128xf32> to vector<1x8x128xf32>
    tpu.vector_store %arg8[%c4_163, %c0_164, %c0_165], %312 {strides = array<i32>} : memref<8x8x128xf32, #tpu.memory_space<vmem>>, vector<1x8x128xf32>,
    %c4_166 = arith.constant 4 : index
    %c0_167 = arith.constant 0 : index
    %c0_168 = arith.constant 0 : index
    %313 = vector.load %arg9[%c4_166, %c0_167, %c0_168] : memref<8x8x128xf32, #tpu.memory_space<vmem>>, vector<1x8x128xf32>
    %314 = vector.shape_cast %313 : vector<1x8x128xf32> to vector<8x128xf32>
    %315 = vector.shape_cast %305 : vector<8x128xf32> to vector<1x8x128xf32>
    tpu.vector_store %arg9[%c4_166, %c0_167, %c0_168], %315 {strides = array<i32>} : memref<8x8x128xf32, #tpu.memory_space<vmem>>, vector<1x8x128xf32>,
    %c0_169 = arith.constant 0 : index
    %c5 = arith.constant 5 : index
    %c0_170 = arith.constant 0 : index
    %316 = vector.load %arg1[%c0_169, %c5, %c0_170] : memref<8x8x16xf32, #tpu.memory_space<vmem>>, vector<8x1x16xf32>
    %317 = vector.shape_cast %316 : vector<8x1x16xf32> to vector<8x16xf32>
    %cst_171 = arith.constant dense<0.000000e+00> : vector<8x32xf32>
    %318 = tpu.matmul %317, %3, %cst_171 {dimension_numbers = #tpu.dot_dimension_numbers<[1], [0], [0], [1], [0, 0, 1, 1], [], []>} : vector<8x16xf32>, vector<16x32xf32>, vector<8x32xf32> -> vector<8x32xf32>
    %cst_172 = arith.constant 0.000000e+00 : f32
    %319 = vector.broadcast %cst_172 : f32 to vector<8x32xf32>
    %320 = arith.cmpf ogt, %271, %319 : vector<8x32xf32>
    %321 = arith.mulf %275, %8 : vector<8x32xf32>
    %cst_173 = arith.constant 0.000000e+00 : f32
    %322 = vector.broadcast %cst_173 : f32 to vector<8x32xf32>
    %323 = arith.select %320, %322, %321 : vector<8x32xi1>, vector<8x32xf32>
    %324 = arith.addf %323, %318 : vector<8x32xf32>
    %cst_174 = arith.constant 3.000000e-01 : f32
    %325 = vector.broadcast %cst_174 : f32 to vector<8x32xf32>
    %326 = arith.subf %324, %325 : vector<8x32xf32>
    %cst_175 = arith.constant 0.000000e+00 : f32
    %327 = vector.broadcast %cst_175 : f32 to vector<8x32xf32>
    %328 = arith.cmpf ogt, %326, %327 : vector<8x32xf32>
    %329 = arith.extui %328 : vector<8x32xi1> to vector<8x32xi32>
    %330 = arith.sitofp %329 : vector<8x32xi32> to vector<8x32xf32>
    %cst_176 = arith.constant 3.000000e-01 : f32
    %331 = vector.broadcast %cst_176 : f32 to vector<8x32xf32>
    %332 = arith.cmpf olt, %324, %331 : vector<8x32xf32>
    %cst_177 = arith.constant 0.000000e+00 : f32
    %333 = vector.broadcast %cst_177 : f32 to vector<8x32xf32>
    %334 = arith.select %332, %324, %333 : vector<8x32xi1>, vector<8x32xf32>
    %cst_178 = arith.constant dense<0.000000e+00> : vector<8x32xf32>
    %335 = tpu.matmul %330, %4, %cst_178 {dimension_numbers = #tpu.dot_dimension_numbers<[1], [0], [0], [1], [0, 0, 1, 1], [], []>} : vector<8x32xf32>, vector<32x32xf32>, vector<8x32xf32> -> vector<8x32xf32>
    %cst_179 = arith.constant 0.000000e+00 : f32
    %336 = vector.broadcast %cst_179 : f32 to vector<8x32xf32>
    %337 = arith.cmpf ogt, %288, %336 : vector<8x32xf32>
    %338 = arith.mulf %292, %11 : vector<8x32xf32>
    %cst_180 = arith.constant 0.000000e+00 : f32
    %339 = vector.broadcast %cst_180 : f32 to vector<8x32xf32>
    %340 = arith.select %337, %339, %338 : vector<8x32xi1>, vector<8x32xf32>
    %341 = arith.addf %340, %335 : vector<8x32xf32>
    %cst_181 = arith.constant 3.000000e-01 : f32
    %342 = vector.broadcast %cst_181 : f32 to vector<8x32xf32>
    %343 = arith.subf %341, %342 : vector<8x32xf32>
    %cst_182 = arith.constant 0.000000e+00 : f32
    %344 = vector.broadcast %cst_182 : f32 to vector<8x32xf32>
    %345 = arith.cmpf ogt, %343, %344 : vector<8x32xf32>
    %346 = arith.extui %345 : vector<8x32xi1> to vector<8x32xi32>
    %347 = arith.sitofp %346 : vector<8x32xi32> to vector<8x32xf32>
    %cst_183 = arith.constant 3.000000e-01 : f32
    %348 = vector.broadcast %cst_183 : f32 to vector<8x32xf32>
    %349 = arith.cmpf olt, %341, %348 : vector<8x32xf32>
    %cst_184 = arith.constant 0.000000e+00 : f32
    %350 = vector.broadcast %cst_184 : f32 to vector<8x32xf32>
    %351 = arith.select %349, %341, %350 : vector<8x32xi1>, vector<8x32xf32>
    %cst_185 = arith.constant dense<0.000000e+00> : vector<8x128xf32>
    %352 = tpu.matmul %347, %5, %cst_185 {dimension_numbers = #tpu.dot_dimension_numbers<[1], [0], [0], [1], [0, 0, 1, 1], [], []>} : vector<8x32xf32>, vector<32x128xf32>, vector<8x128xf32> -> vector<8x128xf32>
    %cst_186 = arith.constant 0.000000e+00 : f32
    %353 = vector.broadcast %cst_186 : f32 to vector<8x128xf32>
    %354 = arith.cmpf ogt, %305, %353 : vector<8x128xf32>
    %355 = arith.mulf %309, %14 : vector<8x128xf32>
    %cst_187 = arith.constant 0.000000e+00 : f32
    %356 = vector.broadcast %cst_187 : f32 to vector<8x128xf32>
    %357 = arith.select %354, %356, %355 : vector<8x128xi1>, vector<8x128xf32>
    %358 = arith.addf %357, %352 : vector<8x128xf32>
    %cst_188 = arith.constant 1.000000e+06 : f32
    %359 = vector.broadcast %cst_188 : f32 to vector<8x128xf32>
    %360 = arith.subf %358, %359 : vector<8x128xf32>
    %cst_189 = arith.constant 0.000000e+00 : f32
    %361 = vector.broadcast %cst_189 : f32 to vector<8x128xf32>
    %362 = arith.cmpf ogt, %360, %361 : vector<8x128xf32>
    %363 = arith.extui %362 : vector<8x128xi1> to vector<8x128xi32>
    %364 = arith.sitofp %363 : vector<8x128xi32> to vector<8x128xf32>
    %cst_190 = arith.constant 1.000000e+06 : f32
    %365 = vector.broadcast %cst_190 : f32 to vector<8x128xf32>
    %366 = arith.cmpf olt, %358, %365 : vector<8x128xf32>
    %cst_191 = arith.constant 0.000000e+00 : f32
    %367 = vector.broadcast %cst_191 : f32 to vector<8x128xf32>
    %368 = arith.select %366, %358, %367 : vector<8x128xi1>, vector<8x128xf32>
    %c5_192 = arith.constant 5 : index
    %c0_193 = arith.constant 0 : index
    %c0_194 = arith.constant 0 : index
    %369 = vector.load %arg8[%c5_192, %c0_193, %c0_194] : memref<8x8x128xf32, #tpu.memory_space<vmem>>, vector<1x8x128xf32>
    %370 = vector.shape_cast %369 : vector<1x8x128xf32> to vector<8x128xf32>
    %371 = vector.shape_cast %368 : vector<8x128xf32> to vector<1x8x128xf32>
    tpu.vector_store %arg8[%c5_192, %c0_193, %c0_194], %371 {strides = array<i32>} : memref<8x8x128xf32, #tpu.memory_space<vmem>>, vector<1x8x128xf32>,
    %c5_195 = arith.constant 5 : index
    %c0_196 = arith.constant 0 : index
    %c0_197 = arith.constant 0 : index
    %372 = vector.load %arg9[%c5_195, %c0_196, %c0_197] : memref<8x8x128xf32, #tpu.memory_space<vmem>>, vector<1x8x128xf32>
    %373 = vector.shape_cast %372 : vector<1x8x128xf32> to vector<8x128xf32>
    %374 = vector.shape_cast %364 : vector<8x128xf32> to vector<1x8x128xf32>
    tpu.vector_store %arg9[%c5_195, %c0_196, %c0_197], %374 {strides = array<i32>} : memref<8x8x128xf32, #tpu.memory_space<vmem>>, vector<1x8x128xf32>,
    %c0_198 = arith.constant 0 : index
    %c6 = arith.constant 6 : index
    %c0_199 = arith.constant 0 : index
    %375 = vector.load %arg1[%c0_198, %c6, %c0_199] : memref<8x8x16xf32, #tpu.memory_space<vmem>>, vector<8x1x16xf32>
    %376 = vector.shape_cast %375 : vector<8x1x16xf32> to vector<8x16xf32>
    %cst_200 = arith.constant dense<0.000000e+00> : vector<8x32xf32>
    %377 = tpu.matmul %376, %3, %cst_200 {dimension_numbers = #tpu.dot_dimension_numbers<[1], [0], [0], [1], [0, 0, 1, 1], [], []>} : vector<8x16xf32>, vector<16x32xf32>, vector<8x32xf32> -> vector<8x32xf32>
    %cst_201 = arith.constant 0.000000e+00 : f32
    %378 = vector.broadcast %cst_201 : f32 to vector<8x32xf32>
    %379 = arith.cmpf ogt, %330, %378 : vector<8x32xf32>
    %380 = arith.mulf %334, %8 : vector<8x32xf32>
    %cst_202 = arith.constant 0.000000e+00 : f32
    %381 = vector.broadcast %cst_202 : f32 to vector<8x32xf32>
    %382 = arith.select %379, %381, %380 : vector<8x32xi1>, vector<8x32xf32>
    %383 = arith.addf %382, %377 : vector<8x32xf32>
    %cst_203 = arith.constant 3.000000e-01 : f32
    %384 = vector.broadcast %cst_203 : f32 to vector<8x32xf32>
    %385 = arith.subf %383, %384 : vector<8x32xf32>
    %cst_204 = arith.constant 0.000000e+00 : f32
    %386 = vector.broadcast %cst_204 : f32 to vector<8x32xf32>
    %387 = arith.cmpf ogt, %385, %386 : vector<8x32xf32>
    %388 = arith.extui %387 : vector<8x32xi1> to vector<8x32xi32>
    %389 = arith.sitofp %388 : vector<8x32xi32> to vector<8x32xf32>
    %cst_205 = arith.constant 3.000000e-01 : f32
    %390 = vector.broadcast %cst_205 : f32 to vector<8x32xf32>
    %391 = arith.cmpf olt, %383, %390 : vector<8x32xf32>
    %cst_206 = arith.constant 0.000000e+00 : f32
    %392 = vector.broadcast %cst_206 : f32 to vector<8x32xf32>
    %393 = arith.select %391, %383, %392 : vector<8x32xi1>, vector<8x32xf32>
    %cst_207 = arith.constant dense<0.000000e+00> : vector<8x32xf32>
    %394 = tpu.matmul %389, %4, %cst_207 {dimension_numbers = #tpu.dot_dimension_numbers<[1], [0], [0], [1], [0, 0, 1, 1], [], []>} : vector<8x32xf32>, vector<32x32xf32>, vector<8x32xf32> -> vector<8x32xf32>
    %cst_208 = arith.constant 0.000000e+00 : f32
    %395 = vector.broadcast %cst_208 : f32 to vector<8x32xf32>
    %396 = arith.cmpf ogt, %347, %395 : vector<8x32xf32>
    %397 = arith.mulf %351, %11 : vector<8x32xf32>
    %cst_209 = arith.constant 0.000000e+00 : f32
    %398 = vector.broadcast %cst_209 : f32 to vector<8x32xf32>
    %399 = arith.select %396, %398, %397 : vector<8x32xi1>, vector<8x32xf32>
    %400 = arith.addf %399, %394 : vector<8x32xf32>
    %cst_210 = arith.constant 3.000000e-01 : f32
    %401 = vector.broadcast %cst_210 : f32 to vector<8x32xf32>
    %402 = arith.subf %400, %401 : vector<8x32xf32>
    %cst_211 = arith.constant 0.000000e+00 : f32
    %403 = vector.broadcast %cst_211 : f32 to vector<8x32xf32>
    %404 = arith.cmpf ogt, %402, %403 : vector<8x32xf32>
    %405 = arith.extui %404 : vector<8x32xi1> to vector<8x32xi32>
    %406 = arith.sitofp %405 : vector<8x32xi32> to vector<8x32xf32>
    %cst_212 = arith.constant 3.000000e-01 : f32
    %407 = vector.broadcast %cst_212 : f32 to vector<8x32xf32>
    %408 = arith.cmpf olt, %400, %407 : vector<8x32xf32>
    %cst_213 = arith.constant 0.000000e+00 : f32
    %409 = vector.broadcast %cst_213 : f32 to vector<8x32xf32>
    %410 = arith.select %408, %400, %409 : vector<8x32xi1>, vector<8x32xf32>
    %cst_214 = arith.constant dense<0.000000e+00> : vector<8x128xf32>
    %411 = tpu.matmul %406, %5, %cst_214 {dimension_numbers = #tpu.dot_dimension_numbers<[1], [0], [0], [1], [0, 0, 1, 1], [], []>} : vector<8x32xf32>, vector<32x128xf32>, vector<8x128xf32> -> vector<8x128xf32>
    %cst_215 = arith.constant 0.000000e+00 : f32
    %412 = vector.broadcast %cst_215 : f32 to vector<8x128xf32>
    %413 = arith.cmpf ogt, %364, %412 : vector<8x128xf32>
    %414 = arith.mulf %368, %14 : vector<8x128xf32>
    %cst_216 = arith.constant 0.000000e+00 : f32
    %415 = vector.broadcast %cst_216 : f32 to vector<8x128xf32>
    %416 = arith.select %413, %415, %414 : vector<8x128xi1>, vector<8x128xf32>
    %417 = arith.addf %416, %411 : vector<8x128xf32>
    %cst_217 = arith.constant 1.000000e+06 : f32
    %418 = vector.broadcast %cst_217 : f32 to vector<8x128xf32>
    %419 = arith.subf %417, %418 : vector<8x128xf32>
    %cst_218 = arith.constant 0.000000e+00 : f32
    %420 = vector.broadcast %cst_218 : f32 to vector<8x128xf32>
    %421 = arith.cmpf ogt, %419, %420 : vector<8x128xf32>
    %422 = arith.extui %421 : vector<8x128xi1> to vector<8x128xi32>
    %423 = arith.sitofp %422 : vector<8x128xi32> to vector<8x128xf32>
    %cst_219 = arith.constant 1.000000e+06 : f32
    %424 = vector.broadcast %cst_219 : f32 to vector<8x128xf32>
    %425 = arith.cmpf olt, %417, %424 : vector<8x128xf32>
    %cst_220 = arith.constant 0.000000e+00 : f32
    %426 = vector.broadcast %cst_220 : f32 to vector<8x128xf32>
    %427 = arith.select %425, %417, %426 : vector<8x128xi1>, vector<8x128xf32>
    %c6_221 = arith.constant 6 : index
    %c0_222 = arith.constant 0 : index
    %c0_223 = arith.constant 0 : index
    %428 = vector.load %arg8[%c6_221, %c0_222, %c0_223] : memref<8x8x128xf32, #tpu.memory_space<vmem>>, vector<1x8x128xf32>
    %429 = vector.shape_cast %428 : vector<1x8x128xf32> to vector<8x128xf32>
    %430 = vector.shape_cast %427 : vector<8x128xf32> to vector<1x8x128xf32>
    tpu.vector_store %arg8[%c6_221, %c0_222, %c0_223], %430 {strides = array<i32>} : memref<8x8x128xf32, #tpu.memory_space<vmem>>, vector<1x8x128xf32>,
    %c6_224 = arith.constant 6 : index
    %c0_225 = arith.constant 0 : index
    %c0_226 = arith.constant 0 : index
    %431 = vector.load %arg9[%c6_224, %c0_225, %c0_226] : memref<8x8x128xf32, #tpu.memory_space<vmem>>, vector<1x8x128xf32>
    %432 = vector.shape_cast %431 : vector<1x8x128xf32> to vector<8x128xf32>
    %433 = vector.shape_cast %423 : vector<8x128xf32> to vector<1x8x128xf32>
    tpu.vector_store %arg9[%c6_224, %c0_225, %c0_226], %433 {strides = array<i32>} : memref<8x8x128xf32, #tpu.memory_space<vmem>>, vector<1x8x128xf32>,
    %c0_227 = arith.constant 0 : index
    %c7 = arith.constant 7 : index
    %c0_228 = arith.constant 0 : index
    %434 = vector.load %arg1[%c0_227, %c7, %c0_228] : memref<8x8x16xf32, #tpu.memory_space<vmem>>, vector<8x1x16xf32>
    %435 = vector.shape_cast %434 : vector<8x1x16xf32> to vector<8x16xf32>
    %cst_229 = arith.constant dense<0.000000e+00> : vector<8x32xf32>
    %436 = tpu.matmul %435, %3, %cst_229 {dimension_numbers = #tpu.dot_dimension_numbers<[1], [0], [0], [1], [0, 0, 1, 1], [], []>} : vector<8x16xf32>, vector<16x32xf32>, vector<8x32xf32> -> vector<8x32xf32>
    %cst_230 = arith.constant 0.000000e+00 : f32
    %437 = vector.broadcast %cst_230 : f32 to vector<8x32xf32>
    %438 = arith.cmpf ogt, %389, %437 : vector<8x32xf32>
    %439 = arith.mulf %393, %8 : vector<8x32xf32>
    %cst_231 = arith.constant 0.000000e+00 : f32
    %440 = vector.broadcast %cst_231 : f32 to vector<8x32xf32>
    %441 = arith.select %438, %440, %439 : vector<8x32xi1>, vector<8x32xf32>
    %442 = arith.addf %441, %436 : vector<8x32xf32>
    %cst_232 = arith.constant 3.000000e-01 : f32
    %443 = vector.broadcast %cst_232 : f32 to vector<8x32xf32>
    %444 = arith.subf %442, %443 : vector<8x32xf32>
    %cst_233 = arith.constant 0.000000e+00 : f32
    %445 = vector.broadcast %cst_233 : f32 to vector<8x32xf32>
    %446 = arith.cmpf ogt, %444, %445 : vector<8x32xf32>
    %447 = arith.extui %446 : vector<8x32xi1> to vector<8x32xi32>
    %448 = arith.sitofp %447 : vector<8x32xi32> to vector<8x32xf32>
    %cst_234 = arith.constant 3.000000e-01 : f32
    %449 = vector.broadcast %cst_234 : f32 to vector<8x32xf32>
    %450 = arith.cmpf olt, %442, %449 : vector<8x32xf32>
    %cst_235 = arith.constant 0.000000e+00 : f32
    %451 = vector.broadcast %cst_235 : f32 to vector<8x32xf32>
    %452 = arith.select %450, %442, %451 : vector<8x32xi1>, vector<8x32xf32>
    %cst_236 = arith.constant dense<0.000000e+00> : vector<8x32xf32>
    %453 = tpu.matmul %448, %4, %cst_236 {dimension_numbers = #tpu.dot_dimension_numbers<[1], [0], [0], [1], [0, 0, 1, 1], [], []>} : vector<8x32xf32>, vector<32x32xf32>, vector<8x32xf32> -> vector<8x32xf32>
    %cst_237 = arith.constant 0.000000e+00 : f32
    %454 = vector.broadcast %cst_237 : f32 to vector<8x32xf32>
    %455 = arith.cmpf ogt, %406, %454 : vector<8x32xf32>
    %456 = arith.mulf %410, %11 : vector<8x32xf32>
    %cst_238 = arith.constant 0.000000e+00 : f32
    %457 = vector.broadcast %cst_238 : f32 to vector<8x32xf32>
    %458 = arith.select %455, %457, %456 : vector<8x32xi1>, vector<8x32xf32>
    %459 = arith.addf %458, %453 : vector<8x32xf32>
    %cst_239 = arith.constant 3.000000e-01 : f32
    %460 = vector.broadcast %cst_239 : f32 to vector<8x32xf32>
    %461 = arith.subf %459, %460 : vector<8x32xf32>
    %cst_240 = arith.constant 0.000000e+00 : f32
    %462 = vector.broadcast %cst_240 : f32 to vector<8x32xf32>
    %463 = arith.cmpf ogt, %461, %462 : vector<8x32xf32>
    %464 = arith.extui %463 : vector<8x32xi1> to vector<8x32xi32>
    %465 = arith.sitofp %464 : vector<8x32xi32> to vector<8x32xf32>
    %cst_241 = arith.constant 3.000000e-01 : f32
    %466 = vector.broadcast %cst_241 : f32 to vector<8x32xf32>
    %467 = arith.cmpf olt, %459, %466 : vector<8x32xf32>
    %cst_242 = arith.constant 0.000000e+00 : f32
    %468 = vector.broadcast %cst_242 : f32 to vector<8x32xf32>
    %469 = arith.select %467, %459, %468 : vector<8x32xi1>, vector<8x32xf32>
    %cst_243 = arith.constant dense<0.000000e+00> : vector<8x128xf32>
    %470 = tpu.matmul %465, %5, %cst_243 {dimension_numbers = #tpu.dot_dimension_numbers<[1], [0], [0], [1], [0, 0, 1, 1], [], []>} : vector<8x32xf32>, vector<32x128xf32>, vector<8x128xf32> -> vector<8x128xf32>
    %cst_244 = arith.constant 0.000000e+00 : f32
    %471 = vector.broadcast %cst_244 : f32 to vector<8x128xf32>
    %472 = arith.cmpf ogt, %423, %471 : vector<8x128xf32>
    %473 = arith.mulf %427, %14 : vector<8x128xf32>
    %cst_245 = arith.constant 0.000000e+00 : f32
    %474 = vector.broadcast %cst_245 : f32 to vector<8x128xf32>
    %475 = arith.select %472, %474, %473 : vector<8x128xi1>, vector<8x128xf32>
    %476 = arith.addf %475, %470 : vector<8x128xf32>
    %cst_246 = arith.constant 1.000000e+06 : f32
    %477 = vector.broadcast %cst_246 : f32 to vector<8x128xf32>
    %478 = arith.subf %476, %477 : vector<8x128xf32>
    %cst_247 = arith.constant 0.000000e+00 : f32
    %479 = vector.broadcast %cst_247 : f32 to vector<8x128xf32>
    %480 = arith.cmpf ogt, %478, %479 : vector<8x128xf32>
    %481 = arith.extui %480 : vector<8x128xi1> to vector<8x128xi32>
    %482 = arith.sitofp %481 : vector<8x128xi32> to vector<8x128xf32>
    %cst_248 = arith.constant 1.000000e+06 : f32
    %483 = vector.broadcast %cst_248 : f32 to vector<8x128xf32>
    %484 = arith.cmpf olt, %476, %483 : vector<8x128xf32>
    %cst_249 = arith.constant 0.000000e+00 : f32
    %485 = vector.broadcast %cst_249 : f32 to vector<8x128xf32>
    %486 = arith.select %484, %476, %485 : vector<8x128xi1>, vector<8x128xf32>
    %c7_250 = arith.constant 7 : index
    %c0_251 = arith.constant 0 : index
    %c0_252 = arith.constant 0 : index
    %487 = vector.load %arg8[%c7_250, %c0_251, %c0_252] : memref<8x8x128xf32, #tpu.memory_space<vmem>>, vector<1x8x128xf32>
    %488 = vector.shape_cast %487 : vector<1x8x128xf32> to vector<8x128xf32>
    %489 = vector.shape_cast %486 : vector<8x128xf32> to vector<1x8x128xf32>
    tpu.vector_store %arg8[%c7_250, %c0_251, %c0_252], %489 {strides = array<i32>} : memref<8x8x128xf32, #tpu.memory_space<vmem>>, vector<1x8x128xf32>,
    %c7_253 = arith.constant 7 : index
    %c0_254 = arith.constant 0 : index
    %c0_255 = arith.constant 0 : index
    %490 = vector.load %arg9[%c7_253, %c0_254, %c0_255] : memref<8x8x128xf32, #tpu.memory_space<vmem>>, vector<1x8x128xf32>
    %491 = vector.shape_cast %490 : vector<1x8x128xf32> to vector<8x128xf32>
    %492 = vector.shape_cast %482 : vector<8x128xf32> to vector<1x8x128xf32>
    tpu.vector_store %arg9[%c7_253, %c0_254, %c0_255], %492 {strides = array<i32>} : memref<8x8x128xf32, #tpu.memory_space<vmem>>, vector<1x8x128xf32>,
    %c0_256 = arith.constant 0 : index
    %c0_257 = arith.constant 0 : index
    %493 = vector.load %arg10[%c0_256, %c0_257] : memref<8x32xf32, #tpu.memory_space<vmem>>, vector<8x32xf32>
    tpu.vector_store %arg10[%c0_256, %c0_257], %452 {strides = array<i32>} : memref<8x32xf32, #tpu.memory_space<vmem>>, vector<8x32xf32>,
    %c0_258 = arith.constant 0 : index
    %c0_259 = arith.constant 0 : index
    %494 = vector.load %arg11[%c0_258, %c0_259] : memref<8x32xf32, #tpu.memory_space<vmem>>, vector<8x32xf32>
    tpu.vector_store %arg11[%c0_258, %c0_259], %448 {strides = array<i32>} : memref<8x32xf32, #tpu.memory_space<vmem>>, vector<8x32xf32>,
    %c0_260 = arith.constant 0 : index
    %c0_261 = arith.constant 0 : index
    %495 = vector.load %arg12[%c0_260, %c0_261] : memref<8x32xf32, #tpu.memory_space<vmem>>, vector<8x32xf32>
    tpu.vector_store %arg12[%c0_260, %c0_261], %469 {strides = array<i32>} : memref<8x32xf32, #tpu.memory_space<vmem>>, vector<8x32xf32>,
    %c0_262 = arith.constant 0 : index
    %c0_263 = arith.constant 0 : index
    %496 = vector.load %arg13[%c0_262, %c0_263] : memref<8x32xf32, #tpu.memory_space<vmem>>, vector<8x32xf32>
    tpu.vector_store %arg13[%c0_262, %c0_263], %465 {strides = array<i32>} : memref<8x32xf32, #tpu.memory_space<vmem>>, vector<8x32xf32>,
    %c0_264 = arith.constant 0 : index
    %c0_265 = arith.constant 0 : index
    %497 = vector.load %arg14[%c0_264, %c0_265] : memref<8x128xf32, #tpu.memory_space<vmem>>, vector<8x128xf32>
    tpu.vector_store %arg14[%c0_264, %c0_265], %486 {strides = array<i32>} : memref<8x128xf32, #tpu.memory_space<vmem>>, vector<8x128xf32>,
    %c0_266 = arith.constant 0 : index
    %c0_267 = arith.constant 0 : index
    %498 = vector.load %arg15[%c0_266, %c0_267] : memref<8x128xf32, #tpu.memory_space<vmem>>, vector<8x128xf32>
    tpu.vector_store %arg15[%c0_266, %c0_267], %482 {strides = array<i32>} : memref<8x128xf32, #tpu.memory_space<vmem>>, vector<8x128xf32>,
    return
  }
  func.func @transform_0(%arg0: i32) -> (i32, i32, i32) {
    %c0_i32 = arith.constant 0 : i32
    %c0_i32_0 = arith.constant 0 : i32
    %c0_i32_1 = arith.constant 0 : i32
    return %c0_i32, %arg0, %c0_i32_0 : i32, i32, i32
  }
  func.func @transform_1(%arg0: i32) -> (i32, i32) {
    %c0_i32 = arith.constant 0 : i32
    %c0_i32_0 = arith.constant 0 : i32
    %c0_i32_1 = arith.constant 0 : i32
    return %c0_i32, %c0_i32_0 : i32, i32
  }
  func.func @transform_2(%arg0: i32) -> (i32, i32) {
    %c0_i32 = arith.constant 0 : i32
    %c0_i32_0 = arith.constant 0 : i32
    %c0_i32_1 = arith.constant 0 : i32
    return %c0_i32, %c0_i32_0 : i32, i32
  }
  func.func @transform_3(%arg0: i32) -> (i32, i32) {
    %c0_i32 = arith.constant 0 : i32
    %c0_i32_0 = arith.constant 0 : i32
    %c0_i32_1 = arith.constant 0 : i32
    return %c0_i32, %c0_i32_0 : i32, i32
  }
  func.func @transform_4(%arg0: i32) -> (i32, i32) {
    %c0_i32 = arith.constant 0 : i32
    %c0_i32_0 = arith.constant 0 : i32
    %c0_i32_1 = arith.constant 0 : i32
    return %c0_i32, %c0_i32_0 : i32, i32
  }
  func.func @transform_5(%arg0: i32) -> (i32, i32) {
    %c0_i32 = arith.constant 0 : i32
    %c0_i32_0 = arith.constant 0 : i32
    %c0_i32_1 = arith.constant 0 : i32
    return %c0_i32, %c0_i32_0 : i32, i32
  }
  func.func @transform_6(%arg0: i32) -> (i32, i32) {
    %c0_i32 = arith.constant 0 : i32
    %c0_i32_0 = arith.constant 0 : i32
    %c0_i32_1 = arith.constant 0 : i32
    return %c0_i32, %c0_i32_0 : i32, i32
  }
  func.func @transform_7(%arg0: i32) -> (i32, i32, i32) {
    %c0_i32 = arith.constant 0 : i32
    %c0_i32_0 = arith.constant 0 : i32
    %c0_i32_1 = arith.constant 0 : i32
    return %arg0, %c0_i32, %c0_i32_0 : i32, i32, i32
  }
  func.func @transform_8(%arg0: i32) -> (i32, i32, i32) {
    %c0_i32 = arith.constant 0 : i32
    %c0_i32_0 = arith.constant 0 : i32
    %c0_i32_1 = arith.constant 0 : i32
    return %arg0, %c0_i32, %c0_i32_0 : i32, i32, i32
  }
}

</mosaic_0001>

<bundles_post_ra>
// kernel: tpu_custom_call.1
= control target key start
LH: loop header
LB: loop body
LE: loop exit
PB: predicated region body
PF: predicated region fallthrough
CT: control target
= control target key end

     0   :  { %14 = vsyncpa [#allocation9], 0  ;;  %s3581_s0 = inlined_call_operand.hbm [shape: f32[8,8,16], index: 0, kind: input, shape index: {}]   ;;  %s3582_s1 = inlined_call_operand.hbm [shape: f32[16,32], index: 1, kind: input, shape index: {}]   ;;  %s3583_s2 = inlined_call_operand.hbm [shape: f32[32,32], index: 2, kind: input, shape index: {}]   ;;  %s3584_s3 = inlined_call_operand.hbm [shape: f32[32,128], index: 3, kind: input, shape index: {}]   ;;  %s3585_s4 = inlined_call_operand.vmem [shape: f32[1,32], index: 4, kind: input, shape index: {}]   ;;  %s3586_s5 = inlined_call_operand.vmem [shape: f32[1,32], index: 5, kind: input, shape index: {}]   ;;  %s3587_s6 = inlined_call_operand.vmem [shape: f32[1,128], index: 6, kind: input, shape index: {}]   ;;  %s3588_s7 = inlined_call_operand.hbm [shape: f32[8,8,128], index: 7, kind: output, shape index: {0}]   ;;  %s3589_s8 = inlined_call_operand.hbm [shape: f32[8,8,128], index: 8, kind: output, shape index: {1}]  }
   0x1   :  { %15 = vsyncpa [#allocation12], 0 }
   0x2   :  { %16 = vsyncpa [#allocation15], 0 }
   0x3   :  { %17 = vsyncpa [#allocation10], 0 }
   0x4   :  { %18 = vsyncpa [#allocation18], 0  ;;  %s3121_s27 = smov [#allocation11]   ;;  %s3122_s29 = smov [#allocation8]  }
   0x5   :  { %s36_s28 = sshll.u32 %s3121_s27, 4  ;;  %s24_s30 = sshll.u32 %s3122_s29, 4  ;;  %s37_s28 = int_to_ptr.vmem [resolvable:$true] %s36_s28  ;;  %s3177_s30 = int_to_ptr.vmem [resolvable:$true] %s24_s30 }
   0x6   :  { %s2979_s11 = scalar_lea.hbm %s3582_s1, 256 }
   0x7   :  { %p2980_p0 = scmp.ne.s32.totalorder %s3582_s1, %s2979_s11  ;;  %p2983_p1 = scmp.lt.u32.totalorder %s2979_s11, %s3582_s1 }
   0x9   :  { %p2985_p2 = pnand %p2983_p1, %p2980_p0 }
   0xb   :  { %2988 = shalt.err (!%p2985_p2)
}
   0xc   :  { %s2989_s16 = scalar_lea.vmem %s37_s28, 256  ;;  %p2994_p4 = scmp.lt.s32.totalorder %s37_s28, %s37_s28 }
   0xd   :  { %p2990_p3 = scmp.ne.s32.totalorder %s37_s28, %s2989_s16  ;;  %p2995_p5 = scmp.lt.s32.totalorder %s2989_s16, %s2989_s16 }
   0xf   :  { %p2996_p6 = por %p2995_p5, %p2994_p4 }
  0x11   :  { %p2997_p7 = pnand %p2996_p6, %p2990_p3 }
  0x13   :  { %3000 = shalt.err (!%p2997_p7)
}
  0x14   :  { %s3123_s17 = smov 128   ;;  %s3124_s18 = smov 8  }
  0x15   :  { %42 = dma.hbm_to_vmem [thread:$0]  %s3582_s1, 256, %s37_s28, [#allocation12], %s3123_s17, %s3123_s17, %s3124_s18  }
  0x16   :  { %s3001_s23 = scalar_lea.hbm %s3581_s0, 1024 }
  0x17   :  { %p3002_p8 = scmp.ne.s32.totalorder %s3581_s0, %s3001_s23  ;;  %p3005_p9 = scmp.lt.u32.totalorder %s3001_s23, %s3581_s0 }
  0x19   :  { %p3007_p10 = pnand %p3005_p9, %p3002_p8 }
  0x1b   :  { %3010 = shalt.err (!%p3007_p10)
}
  0x1c   :  { %s3011_s29 = scalar_lea.vmem %s3177_s30, 1024  ;;  %p3016_p12 = scmp.lt.s32.totalorder %s3177_s30, %s3177_s30 }
  0x1d   :  { %p3012_p11 = scmp.ne.s32.totalorder %s3177_s30, %s3011_s29  ;;  %p3017_p13 = scmp.lt.s32.totalorder %s3011_s29, %s3011_s29 }
  0x1f   :  { %p3018_p0 = por %p3017_p13, %p3016_p12 }
  0x21   :  { %p3019_p1 = pnand %p3018_p0, %p3012_p11 }
  0x23   :  { %3022 = shalt.err (!%p3019_p1)
}
  0x24   :  { %30 = dma.hbm_to_vmem [thread:$0]  %s3581_s0, 1024, %s3177_s30, [#allocation9], %s3123_s17, %s3123_s17, %s3124_s18  }
  0x25   :  { %s3125_s9 = smov [#allocation13]   ;;  %s3126_s11 = smov [#allocation14]  }
  0x26   :  { %s48_s10 = sshll.u32 %s3125_s9, 4  ;;  %s60_s12 = sshll.u32 %s3126_s11, 4  ;;  %s49_s10 = int_to_ptr.vmem [resolvable:$true] %s48_s10  ;;  %s3214_s12 = int_to_ptr.vmem [resolvable:$true] %s60_s12 }
  0x27   :  { %s3023_s15 = scalar_lea.hbm %s3583_s2, 512 }
  0x28   :  { %p3024_p2 = scmp.ne.s32.totalorder %s3583_s2, %s3023_s15  ;;  %p3027_p3 = scmp.lt.u32.totalorder %s3023_s15, %s3583_s2 }
  0x2a   :  { %p3029_p4 = pnand %p3027_p3, %p3024_p2 }
  0x2c   :  { %3032 = shalt.err (!%p3029_p4)
}
  0x2d   :  { %s3033_s0 = scalar_lea.vmem %s49_s10, 512  ;;  %p3038_p6 = scmp.lt.s32.totalorder %s49_s10, %s49_s10 }
  0x2e   :  { %p3034_p5 = scmp.ne.s32.totalorder %s49_s10, %s3033_s0  ;;  %p3039_p7 = scmp.lt.s32.totalorder %s3033_s0, %s3033_s0 }
  0x30   :  { %p3040_p8 = por %p3039_p7, %p3038_p6 }
  0x32   :  { %p3041_p9 = pnand %p3040_p8, %p3034_p5 }
  0x34   :  { %3044 = shalt.err (!%p3041_p9)
}
  0x35   :  { %54 = dma.hbm_to_vmem [thread:$0]  %s3583_s2, 512, %s49_s10, [#allocation12], %s3123_s17, %s3123_s17, %s3124_s18  }
  0x36   :  { %s3045_s25 = scalar_lea.hbm %s3584_s3, 512 }
  0x37   :  { %p3046_p10 = scmp.ne.s32.totalorder %s3584_s3, %s3045_s25  ;;  %p3049_p11 = scmp.lt.u32.totalorder %s3045_s25, %s3584_s3 }
  0x39   :  { %p3051_p12 = pnand %p3049_p11, %p3046_p10 }
  0x3b   :  { %3054 = shalt.err (!%p3051_p12)
}
  0x3c   :  { %s3055_s28 = scalar_lea.vmem %s3214_s12, 512  ;;  %p3060_p0 = scmp.lt.s32.totalorder %s3214_s12, %s3214_s12 }
  0x3d   :  { %p3056_p13 = scmp.ne.s32.totalorder %s3214_s12, %s3055_s28  ;;  %p3061_p1 = scmp.lt.s32.totalorder %s3055_s28, %s3055_s28 }
  0x3f   :  { %p3062_p2 = por %p3061_p1, %p3060_p0 }
  0x41   :  { %p3063_p3 = pnand %p3062_p2, %p3056_p13 }
  0x43   :  { %3066 = shalt.err (!%p3063_p3)
}
  0x44   :  { %66 = dma.hbm_to_vmem [thread:$0]  %s3584_s3, 512, %s3214_s12, [#allocation15], %s3123_s17, %s3123_s17, %s3124_s18  }
  0x45   :  { %3111 = dma.done.wait [#allocation9], 1024  }
  0x46   :  { %3112 = vsyncadd [#allocation9], 4294966272 }
  0x47   :  { %3113 = dma.done.wait [#allocation12], 768  }
  0x48   :  { %3114 = vsyncadd [#allocation12], 4294966528 }
  0x49   :  { %3115 = dma.done.wait [#allocation15], 512  }
  0x4a   :  { %3116 = vsyncadd [#allocation15], 4294966784  ;;  %v3127_v0 = vmov 0.0|0.0   ;;  %vm3128_vm0 = vmmov 0   ;;  %v3129_v1 = vmov 0.0   ;;  %vm89_vm1 = vcmask 261120  }
  0x4b   :  { %2848 = vmatprep.subr.bf16.mxu0 %v3127_v0  ;;  %2620 = vmatprep.mubr.msk.f32.mxu0 %vm3128_vm0, %v3129_v1  ;;  %90 = vst.msk [vmem:[#allocation2] sm:$0xff] %vm89_vm1, %v3129_v1  ;;  %91 = vst.msk [vmem:[#allocation3] sm:$0xff] %vm89_vm1, %v3129_v1  ;;  %v96_v2 = vld [vmem:[#allocation11] sm:$0xff]  ;;  %v97_v3 = vld [vmem:[#allocation11 + $0x8] sm:$0xff]  ;;  %vm150_vm2 = vcmask 1041409   ;;  %vm153_vm3 = vcmask 1042434  }
  0x4c   :  { %2851 = vmatprep.subr.bf16.mxu1 %v3127_v0  ;;  %2631 = vmatprep.mubr.msk.f32.mxu1 %vm3128_vm0, %v3129_v1  ;;  %92 = vst.msk [vmem:[#allocation4] sm:$0xff] %vm89_vm1, %v3129_v1  ;;  %93 = vst.msk [vmem:[#allocation5] sm:$0xff] %vm89_vm1, %v3129_v1  ;;  %v3265_v4 = vpack.c.bf16 %v97_v3, %v96_v2  ;;  %v134_v5 = vld [vmem:[#allocation8 + $0x8] sm:$0x1]  ;;  %v135_v6 = vld [vmem:[#allocation8 + $0x10] sm:$0x1] }
  0x4d   :  { %v136_v7 = vld [vmem:[#allocation8 + $0x18] sm:$0x1]  ;;  %v133_v8 = vld [vmem:[#allocation8] sm:$0x1]  ;;  %v138_v10 = vld [vmem:[#allocation8 + $0x28] sm:$0x1] }
  0x4e   :  { %v137_v9 = vld [vmem:[#allocation8 + $0x20] sm:$0x1]  ;;  %2850 = vmatpush3.bf16.msra.mxu0 %v3265_v4  ;;  %v139_v11 = vld [vmem:[#allocation8 + $0x30] sm:$0x1]  ;;  %v149_v12 = vrot.slane %v134_v5, 7  ;;  %v152_v13 = vrot.slane %v135_v6, 6 }
  0x4f   :  { %v155_v14 = vrot.slane %v136_v7, 5  ;;  %v140_v15 = vld [vmem:[#allocation8 + $0x38] sm:$0x1]  ;;  %vm156_vm4 = vcmask 1043459   ;;  %v158_v16 = vrot.slane %v137_v9, 4  ;;  %2857 = vmatprep.subr.bf16.mxu0 %v3127_v0  ;;  %vm159_vm5 = vcmask 1044484  }
  0x50   :  { %v151_v17 = vsel %vm150_vm2, %v149_v12, %v133_v8  ;;  %v161_v18 = vrot.slane %v138_v10, 3  ;;  %vm162_vm6 = vcmask 1045509   ;;  %v164_v20 = vrot.slane %v139_v11, 2  ;;  %v98_v27 = vld [vmem:[#allocation13] sm:$0xff]  ;;  %v99_v28 = vld [vmem:[#allocation13 + $0x8] sm:$0xff]  ;;  %v100_v30 = vld [vmem:[#allocation13 + $0x10] sm:$0xff] }
  0x51   :  { %v154_v19 = vsel %vm153_vm3, %v152_v13, %v151_v17  ;;  %vm165_vm7 = vcmask 1046534   ;;  %v167_v22 = vrot.slane %v140_v15, 1  ;;  %vm168_vm8 = vcmask 1047559   ;;  %v101_v31 = vld [vmem:[#allocation13 + $0x18] sm:$0xff]  ;;  %v102_v33 = vld [vmem:[#allocation14] sm:$0xff]  ;;  %v103_v34 = vld [vmem:[#allocation14 + $0x8] sm:$0xff] }
  0x52   :  { %v157_v21 = vsel %vm156_vm4, %v155_v14, %v154_v19  ;;  %vm170_vm9 = vcmask 130048   ;;  %v3279_v29 = vpack.c.bf16 %v99_v28, %v98_v27  ;;  %v3283_v32 = vpack.c.bf16 %v101_v31, %v100_v30  ;;  %v423_v36 = vld [vmem:[#allocation8 + $0x9] sm:$0x1]  ;;  %v424_v37 = vld [vmem:[#allocation8 + $0x11] sm:$0x1]  ;;  %v127_v44 = vld [vmem:[#allocation2] sm:$0xff] }
  0x53   :  { %v160_v23 = vsel %vm159_vm5, %v158_v16, %v157_v21  ;;  %v3287_v35 = vpack.c.bf16 %v103_v34, %v102_v33  ;;  %v438_v38 = vrot.slane %v423_v36, 7  ;;  %v422_v39 = vld [vmem:[#allocation8 + $0x1] sm:$0x1]  ;;  %v425_v40 = vld [vmem:[#allocation8 + $0x19] sm:$0x1]  ;;  %v440_v41 = vrot.slane %v424_v37, 6 }
  0x54   :  { %v163_v24 = vsel %vm162_vm6, %v161_v18, %v160_v23  ;;  %2853 = vmatpush3.bf16.msra.mxu1 %v3279_v29  ;;  %v3295_v43 = vld [vmem:[%s3585_s4] ss:$0 sm:$0xff]  ;;  %v128_v45 = vld [vmem:[#allocation3] sm:$0xff]  ;;  %v426_v46 = vld [vmem:[#allocation8 + $0x21] sm:$0x1]  ;;  %v442_v47 = vrot.slane %v425_v40, 5 }
  0x55   :  { %v166_v25 = vsel %vm165_vm7, %v164_v20, %v163_v24  ;;  %2854 = vmatprep.subr.bf16.mxu1 %v3127_v0  ;;  %v439_v42 = vsel %vm150_vm2, %v438_v38, %v422_v39  ;;  %v244_v49 = vmul.f32 %v3295_v43, %v127_v44  ;;  %vm243_vm10 = vcmp.gt.f32.partialorder %v128_v45, 0.0  ;;  %v427_v50 = vld [vmem:[#allocation8 + $0x29] sm:$0x1]  ;;  %v428_v54 = vld [vmem:[#allocation8 + $0x31] sm:$0x1]  ;;  %v104_v10 = vld [vmem:[#allocation14 + $0x10] sm:$0xff] }
  0x56   :  { %v169_v26 = vsel %vm168_vm8, %v167_v22, %v166_v25  ;;  %v441_v48 = vsel %vm153_vm3, %v440_v41, %v439_v42  ;;  %v444_v51 = vrot.slane %v426_v46, 4  ;;  %v446_v55 = vrot.slane %v427_v50, 3  ;;  %v429_v60 = vld [vmem:[#allocation8 + $0x39] sm:$0x1]  ;;  %v105_v11 = vld [vmem:[#allocation14 + $0x18] sm:$0xff]  ;;  %v129_v14 = vld [vmem:[#allocation4] sm:$0xff] }
  0x57   :  { %2621 = vmatmul.mubr.msk.f32.vlgmr.msra.gmra.mrb[0].mxu0 %vm170_vm9, %v169_v26  ;;  %v443_v52 = vsel %vm156_vm4, %v442_v47, %v441_v48  ;;  %v245_v53 = vsel %vm243_vm10, 0.0, %v244_v49  ;;  %v448_v61 = vrot.slane %v428_v54, 2  ;;  %v450_v2 = vrot.slane %v429_v60, 1  ;;  %v3325_v13 = vld [vmem:[%s3586_s5] ss:$0 sm:$0xff]  ;;  %v130_v16 = vld [vmem:[#allocation5] sm:$0xff] }
  0x58   :  { %2642 = vmatprep.mubr.msk.f32.mxu0 %vm3128_vm0, %v3129_v1  ;;  %2856 = vmatpush3.bf16.msra.mxu1 %v3283_v32  ;;  %v445_v56 = vsel %vm159_vm5, %v444_v51, %v443_v52  ;;  %v3316_v12 = vpack.c.bf16 %v105_v11, %v104_v10  ;;  %v705_v15 = vld [vmem:[#allocation8 + $0xa] sm:$0x1]  ;;  %v328_v17 = vmul.f32 %v3325_v13, %v129_v14  ;;  %v706_v18 = vld [vmem:[#allocation8 + $0x12] sm:$0x1]  ;;  %vm327_vm14 = vcmp.gt.f32.partialorder %v130_v16, 0.0  ;;  %s3131_s14 = smov [#allocation17]  }
  0x59   :  { %2863 = vmatprep.subr.bf16.mxu1 %v3127_v0  ;;  %2859 = vmatpush3.bf16.msra.mxu0 %v3287_v35  ;;  %v447_v62 = vsel %vm162_vm6, %v446_v55, %v445_v56  ;;  %v720_v19 = vrot.slane %v705_v15, 7  ;;  %v704_v20 = vld [vmem:[#allocation8 + $0x2] sm:$0x1]  ;;  %v707_v21 = vld [vmem:[#allocation8 + $0x1a] sm:$0x1]  ;;  %v722_v22 = vrot.slane %v706_v18, 6 }
  0x5a   :  { %2860 = vmatprep.subr.bf16.mxu0 %v3127_v0  ;;  %v449_v5 = vsel %vm165_vm7, %v448_v61, %v447_v62  ;;  %v329_v23 = vsel %vm327_vm14, 0.0, %v328_v17  ;;  %v708_v26 = vld [vmem:[#allocation8 + $0x22] sm:$0x1]  ;;  %v724_v27 = vrot.slane %v707_v21, 5  ;;  %v709_v33 = vld [vmem:[#allocation8 + $0x2a] sm:$0x1] }
  0x5b   :  { %v451_v8 = vsel %vm168_vm8, %v450_v2, %v449_v5  ;;  %v721_v24 = vsel %vm150_vm2, %v720_v19, %v704_v20  ;;  %v726_v36 = vrot.slane %v708_v26, 4  ;;  %v710_v45 = vld [vmem:[#allocation8 + $0x32] sm:$0x1]  ;;  %v728_v46 = vrot.slane %v709_v33, 3  ;;  %v711_v51 = vld [vmem:[#allocation8 + $0x3a] sm:$0x1] }
  0x5c   :  { %v723_v31 = vsel %vm153_vm3, %v722_v22, %v721_v24  ;;  %v730_v52 = vrot.slane %v710_v45, 2  ;;  %v732_v56 = vrot.slane %v711_v51, 1  ;;  %v3361_v60 = vld [vmem:[%s3587_s6] ss:$0 sm:$0xff]  ;;  %v987_v62 = vld [vmem:[#allocation8 + $0xb] sm:$0x1] }
  0x5d   :  { %2862 = vmatpush3.bf16.msra.mxu0 %v3316_v12  ;;  %v725_v38 = vsel %vm156_vm4, %v724_v27, %v723_v31  ;;  %v411_v61 = vmul.f32 0.0, %v3361_v60  ;;  %v988_v5 = vld [vmem:[#allocation8 + $0x13] sm:$0x1]  ;;  %v989_v10 = vld [vmem:[#allocation8 + $0x1b] sm:$0x1]  ;;  %s3130_s6 = smov [#allocation16]  }
  0x5e   :  { %2866 = vmatprep.subr.bf16.mxu0 %v3127_v0  ;;  %v727_v48 = vsel %vm159_vm5, %v726_v36, %v725_v38  ;;  %v1004_v11 = vrot.slane %v988_v5, 6  ;;  %v990_v18 = vld [vmem:[#allocation8 + $0x23] sm:$0x1]  ;;  %v1006_v19 = vrot.slane %v989_v10, 5  ;;  %v991_v24 = vld [vmem:[#allocation8 + $0x2b] sm:$0x1] }
  0x5f   :  { %v729_v55 = vsel %vm162_vm6, %v728_v46, %v727_v48  ;;  %v1008_v26 = vrot.slane %v990_v18, 4  ;;  %v1010_v38 = vrot.slane %v991_v24, 3  ;;  %s2407_s13 = sshll.u32 %s3130_s6, 4  ;;  %s2419_s15 = sshll.u32 %s3131_s14, 4  ;;  %s2408_s13 = int_to_ptr.vmem [resolvable:$true] %s2407_s13  ;;  %s3543_s15 = int_to_ptr.vmem [resolvable:$true] %s2419_s15 }
  0x60   :  { %s3067_s16 = scalar_lea.vmem %s2408_s13, 1024  ;;  %p3072_p5 = scmp.lt.s32.totalorder %s2408_s13, %s2408_s13 }
  0x61   :  { %p3068_p4 = scmp.ne.s32.totalorder %s2408_s13, %s3067_s16  ;;  %p3073_p6 = scmp.lt.s32.totalorder %s3067_s16, %s3067_s16 }
  0x63   :  { %p3074_p7 = por %p3073_p6, %p3072_p5 }
  0x65   :  { %p3075_p8 = pnand %p3074_p7, %p3068_p4 }
 0x12a   :  { %v239_v57 = vpop.f32.mrb[0].mxu0 }
 0x12b   :  { %v246_v58 = vadd.f32 %v245_v53, %v239_v57  ;;  %v2622_v59 = vpop.f32.mrb[1].mxu0 }
 0x12d   :  { %vm251_vm11 = vcmp.lt.f32.partialorder %v246_v58, 0.3  ;;  %v2441_v63 = vadd.f32 -0.3, %v246_v58 }
 0x12e   :  { %v252_v3 = vsel %vm251_vm11, %v246_v58, 0.0  ;;  %v731_v58 = vsel %vm165_vm7, %v730_v52, %v729_v55 }
 0x12f   :  { %vm248_vm12 = vcmp.gt.f32.partialorder %v2441_v63, 0.0  ;;  %v525_v6 = vmul.f32 %v3295_v43, %v252_v3  ;;  %v733_v59 = vsel %vm168_vm8, %v732_v56, %v731_v58 }
 0x130   :  { %v2442_v7 = vsel %vm248_vm12, 1.0, %v3129_v1 }
 0x131   :  { %2632 = vmatmul.mubr.msk.f32.vlgmr.msra.gmra.mrb[0].mxu1 %vm89_vm1, %v2442_v7  ;;  %vm524_vm13 = vcmp.gt.f32.partialorder %v2442_v7, 0.0  ;;  %v986_v7 = vld [vmem:[#allocation8 + $0x3] sm:$0x1] }
 0x132   :  { %2865 = vmatpush3.bf16.msra.mxu1 %v3265_v4  ;;  %2649 = vmatprep.mubr.msk.f32.mxu1 %vm3128_vm0, %v3129_v1  ;;  %v526_v9 = vsel %vm524_vm13, 0.0, %v525_v6  ;;  %v1002_v6 = vrot.slane %v987_v62, 7 }
 0x133   :  { %2872 = vmatprep.subr.bf16.mxu1 %v3127_v0 }
 0x134   :  { %v1003_v15 = vsel %vm150_vm2, %v1002_v6, %v986_v7 }
 0x135   :  { %2650 = vmatmul.mubr.msk.f32.vlgmr.msra.gmra.mrb[2].mxu1 %vm170_vm9, %v451_v8 }
 0x136   :  { %2874 = vmatpush3.bf16.msra.mxu1 %v3287_v35  ;;  %2671 = vmatprep.mubr.msk.f32.mxu1 %vm3128_vm0, %v3129_v1 }
 0x137   :  { %2875 = vmatprep.subr.bf16.mxu1 %v3127_v0 }
 0x13a   :  { %2877 = vmatpush3.bf16.msra.mxu1 %v3316_v12 }
 0x13b   :  { %2881 = vmatprep.subr.bf16.mxu1 %v3127_v0 }
 0x204   :  { %v323_v25 = vpop.f32.mrb[0].mxu1 }
 0x205   :  { %v330_v28 = vadd.f32 %v329_v23, %v323_v25  ;;  %v2633_v30 = vpop.f32.mrb[1].mxu1  ;;  %v1005_v23 = vsel %vm153_vm3, %v1004_v11, %v1003_v15 }
 0x207   :  { %v2444_v34 = vadd.f32 -0.3, %v330_v28  ;;  %vm335_vm15 = vcmp.lt.f32.partialorder %v330_v28, 0.3 }
 0x208   :  { %v520_v37 = vpop.f32.mrb[2].mxu1  ;;  %v336_v39 = vsel %vm335_vm15, %v330_v28, 0.0  ;;  %v1007_v28 = vsel %vm156_vm4, %v1006_v19, %v1005_v23 }
 0x209   :  { %vm332_vm10 = vcmp.gt.f32.partialorder %v2444_v34, 0.0  ;;  %v527_v40 = vadd.f32 %v526_v9, %v520_v37  ;;  %v2651_v41 = vpop.f32.mrb[3].mxu1  ;;  %v608_v42 = vmul.f32 %v3325_v13, %v336_v39  ;;  %v992_v37 = vld [vmem:[#allocation8 + $0x33] sm:$0x1] }
 0x20a   :  { %v2445_v44 = vsel %vm332_vm10, 1.0, %v3129_v1  ;;  %v1012_v45 = vrot.slane %v992_v37, 2 }
 0x20b   :  { %v2450_v47 = vadd.f32 -0.3, %v527_v40  ;;  %vm532_vm11 = vcmp.lt.f32.partialorder %v527_v40, 0.3  ;;  %2643 = vmatmul.mubr.msk.f32.vlgmr.msra.gmra.mrb[2].mxu0 %vm89_vm1, %v2445_v44  ;;  %vm607_vm12 = vcmp.gt.f32.partialorder %v2445_v44, 0.0 }
 0x20c   :  { %2868 = vmatpush3.bf16.msra.mxu0 %v3279_v29  ;;  %2660 = vmatprep.mubr.msk.f32.mxu0 %vm3128_vm0, %v3129_v1  ;;  %v609_v49 = vsel %vm607_vm12, 0.0, %v608_v42  ;;  %v533_v50 = vsel %vm532_vm11, %v527_v40, 0.0  ;;  %v1009_v40 = vsel %vm159_vm5, %v1008_v26, %v1007_v28  ;;  %v993_v44 = vld [vmem:[#allocation8 + $0x3b] sm:$0x1]  ;;  %v1274_v26 = vld [vmem:[#allocation8 + $0x34] sm:$0x1] }
 0x20d   :  { %vm529_vm13 = vcmp.gt.f32.partialorder %v2450_v47, 0.0  ;;  %2869 = vmatprep.subr.bf16.mxu0 %v3127_v0  ;;  %v807_v53 = vmul.f32 %v3295_v43, %v533_v50  ;;  %v1011_v48 = vsel %vm162_vm6, %v1010_v38, %v1009_v40 }
 0x20e   :  { %v2451_v54 = vsel %vm529_vm13, 1.0, %v3129_v1  ;;  %v1013_v51 = vsel %vm165_vm7, %v1012_v45, %v1011_v48  ;;  %v1551_v45 = vld [vmem:[#allocation8 + $0xd] sm:$0x1] }
 0x20f   :  { %vm806_vm14 = vcmp.gt.f32.partialorder %v2451_v54, 0.0 }
 0x210   :  { %2871 = vmatpush3.bf16.msra.mxu0 %v3283_v32  ;;  %v808_v57 = vsel %vm806_vm14, 0.0, %v807_v53  ;;  %v1269_v53 = vld [vmem:[#allocation8 + $0xc] sm:$0x1] }
 0x211   :  { %2878 = vmatprep.subr.bf16.mxu0 %v3127_v0  ;;  %v1284_v58 = vrot.slane %v1269_v53, 7 }
 0x213   :  { %2661 = vmatmul.mubr.msk.f32.vlgmr.msra.gmra.mrb[4].mxu0 %vm89_vm1, %v2451_v54 }
 0x214   :  { %2880 = vmatpush3.bf16.msra.mxu0 %v3265_v4  ;;  %2678 = vmatprep.mubr.msk.f32.mxu0 %vm3128_vm0, %v3129_v1 }
 0x215   :  { %2887 = vmatprep.subr.bf16.mxu0 %v3127_v0 }
 0x217   :  { %2679 = vmatmul.mubr.msk.f32.vlgmr.msra.gmra.mrb[6].mxu0 %vm170_vm9, %v733_v59  ;;  %v1268_v59 = vld [vmem:[#allocation8 + $0x4] sm:$0x1] }
 0x218   :  { %2889 = vmatpush3.bf16.msra.mxu0 %v3287_v35  ;;  %2700 = vmatprep.mubr.msk.f32.mxu0 %vm3128_vm0, %v3129_v1  ;;  %v1285_v5 = vsel %vm150_vm2, %v1284_v58, %v1268_v59 }
 0x219   :  { %2890 = vmatprep.subr.bf16.mxu0 %v3127_v0 }
 0x21c   :  { %2892 = vmatpush3.bf16.msra.mxu0 %v3316_v12 }
 0x21d   :  { %2896 = vmatprep.subr.bf16.mxu0 %v3127_v0 }
 0x2de   :  { %v406_v63 = vpop.f32.mrb[2].mxu0 }
 0x2df   :  { %v413_v2 = vadd.f32 %v411_v61, %v406_v63  ;;  %v2644_v3 = vpop.f32.mrb[3].mxu0  ;;  %v1271_v63 = vld [vmem:[#allocation8 + $0x1c] sm:$0x1] }
 0x2e1   :  { %vm418_vm15 = vcmp.lt.f32.partialorder %v413_v2, 1000000.0  ;;  %v2447_v8 = vadd.f32 -1000000.0, %v413_v2 }
 0x2e2   :  { %v419_v9 = vsel %vm418_vm15, %v413_v2, 0.0 }
 0x2e3   :  { %vm415_vm10 = vcmp.gt.f32.partialorder %v2447_v8, 0.0  ;;  %420 = vst [vmem:[#allocation16] sm:$0xff] %v419_v9  ;;  %v691_v14 = vmul.f32 %v3361_v60, %v419_v9  ;;  %v1272_v8 = vld [vmem:[#allocation8 + $0x24] sm:$0x1]  ;;  %v1288_v9 = vrot.slane %v1271_v63, 5 }
 0x2e4   :  { %v2448_v16 = vsel %vm415_vm10, 1.0, %v3129_v1  ;;  %v1290_v18 = vrot.slane %v1272_v8, 4 }
 0x2e5   :  { %421 = vst [vmem:[#allocation17] sm:$0xff] %v2448_v16  ;;  %vm690_vm11 = vcmp.gt.f32.partialorder %v2448_v16, 0.0  ;;  %v1273_v16 = vld [vmem:[#allocation8 + $0x2c] sm:$0x1] }
 0x2e6   :  { %v603_v17 = vpop.f32.mrb[4].mxu0  ;;  %v692_v20 = vsel %vm690_vm11, 0.0, %v691_v14 }
 0x2e7   :  { %v610_v21 = vadd.f32 %v609_v49, %v603_v17  ;;  %v2662_v22 = vpop.f32.mrb[5].mxu0  ;;  %v1014_v49 = vrot.slane %v993_v44, 1 }
 0x2e9   :  { %v2453_v25 = vadd.f32 -0.3, %v610_v21  ;;  %vm615_vm12 = vcmp.lt.f32.partialorder %v610_v21, 0.3  ;;  %v1015_v52 = vsel %vm168_vm8, %v1014_v49, %v1013_v51  ;;  %v1552_v49 = vld [vmem:[#allocation8 + $0x15] sm:$0x1] }
 0x2ea   :  { %v802_v27 = vpop.f32.mrb[6].mxu0  ;;  %v616_v30 = vsel %vm615_vm12, %v610_v21, 0.0  ;;  %v1550_v51 = vld [vmem:[#allocation8 + $0x5] sm:$0x1] }
 0x2eb   :  { %vm612_vm13 = vcmp.gt.f32.partialorder %v2453_v25, 0.0  ;;  %v809_v31 = vadd.f32 %v808_v57, %v802_v27  ;;  %v2680_v33 = vpop.f32.mrb[7].mxu0  ;;  %v890_v34 = vmul.f32 %v3325_v13, %v616_v30  ;;  %v1270_v57 = vld [vmem:[#allocation8 + $0x14] sm:$0x1]  ;;  %v1292_v27 = vrot.slane %v1273_v16, 3 }
 0x2ec   :  { %v2454_v36 = vsel %vm612_vm13, 1.0, %v3129_v1  ;;  %v1286_v2 = vrot.slane %v1270_v57, 6 }
 0x2ed   :  { %v2459_v39 = vadd.f32 -0.3, %v809_v31  ;;  %vm814_vm14 = vcmp.lt.f32.partialorder %v809_v31, 0.3  ;;  %2672 = vmatmul.mubr.msk.f32.vlgmr.msra.gmra.mrb[4].mxu1 %vm89_vm1, %v2454_v36  ;;  %vm889_vm15 = vcmp.gt.f32.partialorder %v2454_v36, 0.0  ;;  %v1294_v36 = vrot.slane %v1274_v26, 2 }
 0x2ee   :  { %2883 = vmatpush3.bf16.msra.mxu1 %v3279_v29  ;;  %2689 = vmatprep.mubr.msk.f32.mxu1 %vm3128_vm0, %v3129_v1  ;;  %v891_v41 = vsel %vm889_vm15, 0.0, %v890_v34  ;;  %v815_v42 = vsel %vm814_vm14, %v809_v31, 0.0  ;;  %v1287_v15 = vsel %vm153_vm3, %v1286_v2, %v1285_v5  ;;  %v1275_v34 = vld [vmem:[#allocation8 + $0x3c] sm:$0x1] }
 0x2ef   :  { %vm811_vm10 = vcmp.gt.f32.partialorder %v2459_v39, 0.0  ;;  %2884 = vmatprep.subr.bf16.mxu1 %v3127_v0  ;;  %v1089_v46 = vmul.f32 %v3295_v43, %v815_v42  ;;  %v1296_v40 = vrot.slane %v1275_v34, 1 }
 0x2f0   :  { %v2460_v47 = vsel %vm811_vm10, 1.0, %v3129_v1 }
 0x2f1   :  { %vm1088_vm11 = vcmp.gt.f32.partialorder %v2460_v47, 0.0 }
 0x2f2   :  { %2886 = vmatpush3.bf16.msra.mxu1 %v3283_v32  ;;  %v1090_v50 = vsel %vm1088_vm11, 0.0, %v1089_v46 }
 0x2f3   :  { %2893 = vmatprep.subr.bf16.mxu1 %v3127_v0 }
 0x2f5   :  { %2690 = vmatmul.mubr.msk.f32.vlgmr.msra.gmra.mrb[6].mxu1 %vm89_vm1, %v2460_v47 }
 0x2f6   :  { %2895 = vmatpush3.bf16.msra.mxu1 %v3265_v4  ;;  %2707 = vmatprep.mubr.msk.f32.mxu1 %vm3128_vm0, %v3129_v1 }
 0x2f7   :  { %2902 = vmatprep.subr.bf16.mxu1 %v3127_v0 }
 0x2f9   :  { %2708 = vmatmul.mubr.msk.f32.vlgmr.msra.gmra.mrb[8].mxu1 %vm170_vm9, %v1015_v52 }
 0x2fa   :  { %2904 = vmatpush3.bf16.msra.mxu1 %v3287_v35  ;;  %2729 = vmatprep.mubr.msk.f32.mxu1 %vm3128_vm0, %v3129_v1 }
 0x2fb   :  { %2905 = vmatprep.subr.bf16.mxu1 %v3127_v0 }
 0x2fe   :  { %2907 = vmatpush3.bf16.msra.mxu1 %v3316_v12 }
 0x2ff   :  { %2911 = vmatprep.subr.bf16.mxu1 %v3127_v0 }
 0x3c0   :  { %v686_v54 = vpop.f32.mrb[4].mxu1 }
 0x3c1   :  { %v693_v55 = vadd.f32 %v692_v20, %v686_v54  ;;  %v2673_v56 = vpop.f32.mrb[5].mxu1  ;;  %v1289_v20 = vsel %vm156_vm4, %v1288_v9, %v1287_v15  ;;  %v1553_v54 = vld [vmem:[#allocation8 + $0x1d] sm:$0x1] }
 0x3c2   :  { %v1291_v30 = vsel %vm159_vm5, %v1290_v18, %v1289_v20  ;;  %v1556_v18 = vld [vmem:[#allocation8 + $0x35] sm:$0x1] }
 0x3c3   :  { %vm698_vm12 = vcmp.lt.f32.partialorder %v693_v55, 1000000.0  ;;  %v2456_v61 = vadd.f32 -1000000.0, %v693_v55  ;;  %v1293_v39 = vsel %vm162_vm6, %v1292_v27, %v1291_v30 }
 0x3c4   :  { %v699_v62 = vsel %vm698_vm12, %v693_v55, 0.0  ;;  %v1295_v42 = vsel %vm165_vm7, %v1294_v36, %v1293_v39  ;;  %v1568_v55 = vrot.slane %v1552_v49, 6  ;;  %v1833_v36 = vld [vmem:[#allocation8 + $0xe] sm:$0x1] }
 0x3c5   :  { %vm695_vm13 = vcmp.gt.f32.partialorder %v2456_v61, 0.0  ;;  %701 = vst [vmem:[#allocation16 + $0x8] sm:$0xff] %v699_v62  ;;  %v973_v3 = vmul.f32 %v3361_v60, %v699_v62  ;;  %v1297_v44 = vsel %vm168_vm8, %v1296_v40, %v1295_v42  ;;  %v1554_v61 = vld [vmem:[#allocation8 + $0x25] sm:$0x1]  ;;  %v1570_v62 = vrot.slane %v1553_v54, 5 }
 0x3c6   :  { %v2457_v6 = vsel %vm695_vm13, 1.0, %v3129_v1  ;;  %v1572_v8 = vrot.slane %v1554_v61, 4  ;;  %v1834_v40 = vld [vmem:[#allocation8 + $0x16] sm:$0x1]  ;;  %v1832_v42 = vld [vmem:[#allocation8 + $0x6] sm:$0x1] }
 0x3c7   :  { %703 = vst [vmem:[#allocation17 + $0x8] sm:$0xff] %v2457_v6  ;;  %vm972_vm14 = vcmp.gt.f32.partialorder %v2457_v6, 0.0  ;;  %v1555_v6 = vld [vmem:[#allocation8 + $0x2d] sm:$0x1] }
 0x3c8   :  { %v885_v7 = vpop.f32.mrb[6].mxu1  ;;  %v974_v10 = vsel %vm972_vm14, 0.0, %v973_v3 }
 0x3c9   :  { %v892_v11 = vadd.f32 %v891_v41, %v885_v7  ;;  %v2691_v14 = vpop.f32.mrb[7].mxu1 }
 0x3cb   :  { %v2462_v17 = vadd.f32 -0.3, %v892_v11  ;;  %vm897_vm15 = vcmp.lt.f32.partialorder %v892_v11, 0.3 }
 0x3cc   :  { %v1084_v19 = vpop.f32.mrb[8].mxu1  ;;  %v898_v21 = vsel %vm897_vm15, %v892_v11, 0.0 }
 0x3cd   :  { %vm894_vm10 = vcmp.gt.f32.partialorder %v2462_v17, 0.0  ;;  %v1091_v22 = vadd.f32 %v1090_v50, %v1084_v19  ;;  %v2709_v23 = vpop.f32.mrb[9].mxu1  ;;  %v1172_v24 = vmul.f32 %v3325_v13, %v898_v21  ;;  %v1566_v50 = vrot.slane %v1551_v45, 7 }
 0x3ce   :  { %v2463_v25 = vsel %vm894_vm10, 1.0, %v3129_v1  ;;  %v1574_v19 = vrot.slane %v1555_v6, 3 }
 0x3cf   :  { %v2468_v28 = vadd.f32 -0.3, %v1091_v22  ;;  %vm1096_vm11 = vcmp.lt.f32.partialorder %v1091_v22, 0.3  ;;  %2701 = vmatmul.mubr.msk.f32.vlgmr.msra.gmra.mrb[8].mxu0 %vm89_vm1, %v2463_v25  ;;  %vm1171_vm12 = vcmp.gt.f32.partialorder %v2463_v25, 0.0  ;;  %v1567_v57 = vsel %vm150_vm2, %v1566_v50, %v1550_v51 }
 0x3d0   :  { %2898 = vmatpush3.bf16.msra.mxu0 %v3279_v29  ;;  %2718 = vmatprep.mubr.msk.f32.mxu0 %vm3128_vm0, %v3129_v1  ;;  %v1173_v31 = vsel %vm1171_vm12, 0.0, %v1172_v24  ;;  %v1097_v33 = vsel %vm1096_vm11, %v1091_v22, 0.0  ;;  %v1569_v5 = vsel %vm153_vm3, %v1568_v55, %v1567_v57  ;;  %v1557_v24 = vld [vmem:[#allocation8 + $0x3d] sm:$0x1]  ;;  %v1576_v25 = vrot.slane %v1556_v18, 2 }
 0x3d1   :  { %vm1093_vm13 = vcmp.gt.f32.partialorder %v2468_v28, 0.0  ;;  %2899 = vmatprep.subr.bf16.mxu0 %v3127_v0  ;;  %v1371_v37 = vmul.f32 %v3295_v43, %v1097_v33  ;;  %v1578_v30 = vrot.slane %v1557_v24, 1 }
 0x3d2   :  { %v2469_v38 = vsel %vm1093_vm13, 1.0, %v3129_v1 }
 0x3d3   :  { %vm1370_vm14 = vcmp.gt.f32.partialorder %v2469_v38, 0.0 }
 0x3d4   :  { %2901 = vmatpush3.bf16.msra.mxu0 %v3283_v32  ;;  %v1372_v41 = vsel %vm1370_vm14, 0.0, %v1371_v37 }
 0x3d5   :  { %2908 = vmatprep.subr.bf16.mxu0 %v3127_v0 }
 0x3d7   :  { %2719 = vmatmul.mubr.msk.f32.vlgmr.msra.gmra.mrb[10].mxu0 %vm89_vm1, %v2469_v38 }
 0x3d8   :  { %2910 = vmatpush3.bf16.msra.mxu0 %v3265_v4  ;;  %2736 = vmatprep.mubr.msk.f32.mxu0 %vm3128_vm0, %v3129_v1 }
 0x3d9   :  { %2917 = vmatprep.subr.bf16.mxu0 %v3127_v0 }
 0x3db   :  { %2737 = vmatmul.mubr.msk.f32.vlgmr.msra.gmra.mrb[12].mxu0 %vm170_vm9, %v1297_v44 }
 0x3dc   :  { %2919 = vmatpush3.bf16.msra.mxu0 %v3287_v35  ;;  %2758 = vmatprep.mubr.msk.f32.mxu0 %vm3128_vm0, %v3129_v1 }
 0x3dd   :  { %2920 = vmatprep.subr.bf16.mxu0 %v3127_v0 }
 0x3e0   :  { %2922 = vmatpush3.bf16.msra.mxu0 %v3316_v12 }
 0x3e1   :  { %2926 = vmatprep.subr.bf16.mxu0 %v3127_v0 }
 0x4a2   :  { %v968_v46 = vpop.f32.mrb[8].mxu0 }
 0x4a3   :  { %v975_v47 = vadd.f32 %v974_v10, %v968_v46  ;;  %v2702_v48 = vpop.f32.mrb[9].mxu0  ;;  %v1571_v10 = vsel %vm156_vm4, %v1570_v62, %v1569_v5  ;;  %v1835_v46 = vld [vmem:[#allocation8 + $0x1e] sm:$0x1] }
 0x4a4   :  { %v1573_v21 = vsel %vm159_vm5, %v1572_v8, %v1571_v10  ;;  %v1838_v8 = vld [vmem:[#allocation8 + $0x36] sm:$0x1] }
 0x4a5   :  { %vm980_vm15 = vcmp.lt.f32.partialorder %v975_v47, 1000000.0  ;;  %v2465_v52 = vadd.f32 -1000000.0, %v975_v47  ;;  %v1575_v28 = vsel %vm162_vm6, %v1574_v19, %v1573_v21 }
 0x4a6   :  { %v981_v53 = vsel %vm980_vm15, %v975_v47, 0.0  ;;  %v1577_v33 = vsel %vm165_vm7, %v1576_v25, %v1575_v28  ;;  %v1850_v47 = vrot.slane %v1834_v40, 6  ;;  %v2115_v25 = vld [vmem:[#allocation8 + $0xf] sm:$0x1] }
 0x4a7   :  { %vm977_vm10 = vcmp.gt.f32.partialorder %v2465_v52, 0.0  ;;  %983 = vst [vmem:[#allocation16 + $0x10] sm:$0xff] %v981_v53  ;;  %v1255_v56 = vmul.f32 %v3361_v60, %v981_v53  ;;  %v1579_v34 = vsel %vm168_vm8, %v1578_v30, %v1577_v33  ;;  %v1836_v52 = vld [vmem:[#allocation8 + $0x26] sm:$0x1]  ;;  %v1852_v53 = vrot.slane %v1835_v46, 5 }
 0x4a8   :  { %v2466_v58 = vsel %vm977_vm10, 1.0, %v3129_v1  ;;  %v1854_v61 = vrot.slane %v1836_v52, 4  ;;  %v2116_v30 = vld [vmem:[#allocation8 + $0x17] sm:$0x1]  ;;  %v2114_v33 = vld [vmem:[#allocation8 + $0x7] sm:$0x1] }
 0x4a9   :  { %985 = vst [vmem:[#allocation17 + $0x10] sm:$0xff] %v2466_v58  ;;  %vm1254_vm11 = vcmp.gt.f32.partialorder %v2466_v58, 0.0  ;;  %v1837_v58 = vld [vmem:[#allocation8 + $0x2e] sm:$0x1] }
 0x4aa   :  { %v1167_v59 = vpop.f32.mrb[10].mxu0  ;;  %v1256_v63 = vsel %vm1254_vm11, 0.0, %v1255_v56 }
 0x4ab   :  { %v1174_v2 = vadd.f32 %v1173_v31, %v1167_v59  ;;  %v2720_v3 = vpop.f32.mrb[11].mxu0 }
 0x4ad   :  { %v2471_v7 = vadd.f32 -0.3, %v1174_v2  ;;  %vm1179_vm12 = vcmp.lt.f32.partialorder %v1174_v2, 0.3 }
 0x4ae   :  { %v1366_v9 = vpop.f32.mrb[12].mxu0  ;;  %v1180_v11 = vsel %vm1179_vm12, %v1174_v2, 0.0 }
 0x4af   :  { %vm1176_vm13 = vcmp.gt.f32.partialorder %v2471_v7, 0.0  ;;  %v1373_v14 = vadd.f32 %v1372_v41, %v1366_v9  ;;  %v2738_v15 = vpop.f32.mrb[13].mxu0  ;;  %v1454_v16 = vmul.f32 %v3325_v13, %v1180_v11  ;;  %v1848_v41 = vrot.slane %v1833_v36, 7 }
 0x4b0   :  { %v2472_v17 = vsel %vm1176_vm13, 1.0, %v3129_v1  ;;  %v1856_v9 = vrot.slane %v1837_v58, 3 }
 0x4b1   :  { %v2477_v20 = vadd.f32 -0.3, %v1373_v14  ;;  %vm1378_vm14 = vcmp.lt.f32.partialorder %v1373_v14, 0.3  ;;  %2730 = vmatmul.mubr.msk.f32.vlgmr.msra.gmra.mrb[10].mxu1 %vm89_vm1, %v2472_v17  ;;  %vm1453_vm15 = vcmp.gt.f32.partialorder %v2472_v17, 0.0  ;;  %v1849_v49 = vsel %vm150_vm2, %v1848_v41, %v1832_v42 }
 0x4b2   :  { %2913 = vmatpush3.bf16.msra.mxu1 %v3279_v29  ;;  %2747 = vmatprep.mubr.msk.f32.mxu1 %vm3128_vm0, %v3129_v1  ;;  %v1455_v22 = vsel %vm1453_vm15, 0.0, %v1454_v16  ;;  %v1379_v23 = vsel %vm1378_vm14, %v1373_v14, 0.0  ;;  %v1851_v57 = vsel %vm153_vm3, %v1850_v47, %v1849_v49  ;;  %v1839_v16 = vld [vmem:[#allocation8 + $0x3e] sm:$0x1]  ;;  %v1858_v17 = vrot.slane %v1838_v8, 2 }
 0x4b3   :  { %vm1375_vm10 = vcmp.gt.f32.partialorder %v2477_v20, 0.0  ;;  %2914 = vmatprep.subr.bf16.mxu1 %v3127_v0  ;;  %v1653_v26 = vmul.f32 %v3295_v43, %v1379_v23  ;;  %v1860_v21 = vrot.slane %v1839_v16, 1 }
 0x4b4   :  { %v2478_v27 = vsel %vm1375_vm10, 1.0, %v3129_v1 }
 0x4b5   :  { %vm1652_vm11 = vcmp.gt.f32.partialorder %v2478_v27, 0.0 }
 0x4b6   :  { %2916 = vmatpush3.bf16.msra.mxu1 %v3283_v32  ;;  %v1654_v31 = vsel %vm1652_vm11, 0.0, %v1653_v26 }
 0x4b7   :  { %2923 = vmatprep.subr.bf16.mxu1 %v3127_v0 }
 0x4b9   :  { %2748 = vmatmul.mubr.msk.f32.vlgmr.msra.gmra.mrb[12].mxu1 %vm89_vm1, %v2478_v27 }
 0x4ba   :  { %2925 = vmatpush3.bf16.msra.mxu1 %v3265_v4  ;;  %2765 = vmatprep.mubr.msk.f32.mxu1 %vm3128_vm0, %v3129_v1 }
 0x4bb   :  { %2932 = vmatprep.subr.bf16.mxu1 %v3127_v0 }
 0x4bd   :  { %2766 = vmatmul.mubr.msk.f32.vlgmr.msra.gmra.mrb[14].mxu1 %vm170_vm9, %v1579_v34 }
 0x4be   :  { %2934 = vmatpush3.bf16.msra.mxu1 %v3287_v35  ;;  %2787 = vmatprep.mubr.msk.f32.mxu1 %vm3128_vm0, %v3129_v1 }
 0x4bf   :  { %2935 = vmatprep.subr.bf16.mxu1 %v3127_v0 }
 0x4c2   :  { %2937 = vmatpush3.bf16.msra.mxu1 %v3316_v12 }
 0x4c3   :  { %2941 = vmatprep.subr.bf16.mxu1 %v3127_v0 }
 0x584   :  { %v1250_v37 = vpop.f32.mrb[10].mxu1 }
 0x585   :  { %v1257_v38 = vadd.f32 %v1256_v63, %v1250_v37  ;;  %v2731_v39 = vpop.f32.mrb[11].mxu1  ;;  %v1853_v63 = vsel %vm156_vm4, %v1852_v53, %v1851_v57  ;;  %v2117_v37 = vld [vmem:[#allocation8 + $0x1f] sm:$0x1] }
 0x586   :  { %v1855_v11 = vsel %vm159_vm5, %v1854_v61, %v1853_v63  ;;  %v2120_v61 = vld [vmem:[#allocation8 + $0x37] sm:$0x1] }
 0x587   :  { %vm1262_vm12 = vcmp.lt.f32.partialorder %v1257_v38, 1000000.0  ;;  %v2474_v44 = vadd.f32 -1000000.0, %v1257_v38  ;;  %v1857_v20 = vsel %vm162_vm6, %v1856_v9, %v1855_v11 }
 0x588   :  { %v1263_v45 = vsel %vm1262_vm12, %v1257_v38, 0.0  ;;  %v1859_v23 = vsel %vm165_vm7, %v1858_v17, %v1857_v20  ;;  %v2132_v38 = vrot.slane %v2116_v30, 6 }
 0x589   :  { %vm1259_vm13 = vcmp.gt.f32.partialorder %v2474_v44, 0.0  ;;  %1265 = vst [vmem:[#allocation16 + $0x18] sm:$0xff] %v1263_v45  ;;  %v1537_v48 = vmul.f32 %v3361_v60, %v1263_v45  ;;  %v1861_v24 = vsel %vm168_vm8, %v1860_v21, %v1859_v23  ;;  %v2118_v44 = vld [vmem:[#allocation8 + $0x27] sm:$0x1]  ;;  %v2134_v45 = vrot.slane %v2117_v37, 5 }
 0x58a   :  { %v2475_v50 = vsel %vm1259_vm13, 1.0, %v3129_v1  ;;  %v2136_v52 = vrot.slane %v2118_v44, 4 }
 0x58b   :  { %1267 = vst [vmem:[#allocation17 + $0x18] sm:$0xff] %v2475_v50  ;;  %vm1536_vm14 = vcmp.gt.f32.partialorder %v2475_v50, 0.0  ;;  %v2119_v50 = vld [vmem:[#allocation8 + $0x2f] sm:$0x1] }
 0x58c   :  { %v1449_v51 = vpop.f32.mrb[12].mxu1  ;;  %v1538_v54 = vsel %vm1536_vm14, 0.0, %v1537_v48 }
 0x58d   :  { %v1456_v55 = vadd.f32 %v1455_v22, %v1449_v51  ;;  %v2749_v56 = vpop.f32.mrb[13].mxu1 }
 0x58f   :  { %v2480_v59 = vadd.f32 -0.3, %v1456_v55  ;;  %vm1461_vm15 = vcmp.lt.f32.partialorder %v1456_v55, 0.3 }
 0x590   :  { %v1648_v62 = vpop.f32.mrb[14].mxu1  ;;  %v1462_v2 = vsel %vm1461_vm15, %v1456_v55, 0.0 }
 0x591   :  { %vm1458_vm10 = vcmp.gt.f32.partialorder %v2480_v59, 0.0  ;;  %v1655_v3 = vadd.f32 %v1654_v31, %v1648_v62  ;;  %v2767_v5 = vpop.f32.mrb[15].mxu1  ;;  %v1736_v6 = vmul.f32 %v3325_v13, %v1462_v2  ;;  %v2130_v31 = vrot.slane %v2115_v25, 7 }
 0x592   :  { %v2481_v7 = vsel %vm1458_vm10, 1.0, %v3129_v1  ;;  %v2138_v62 = vrot.slane %v2119_v50, 3 }
 0x593   :  { %v2486_v10 = vadd.f32 -0.3, %v1655_v3  ;;  %vm1660_vm11 = vcmp.lt.f32.partialorder %v1655_v3, 0.3  ;;  %2759 = vmatmul.mubr.msk.f32.vlgmr.msra.gmra.mrb[14].mxu0 %vm89_vm1, %v2481_v7  ;;  %vm1735_vm12 = vcmp.gt.f32.partialorder %v2481_v7, 0.0  ;;  %v2131_v40 = vsel %vm150_vm2, %v2130_v31, %v2114_v33 }
 0x594   :  { %2928 = vmatpush3.bf16.msra.mxu0 %v3279_v29  ;;  %2776 = vmatprep.mubr.msk.f32.mxu0 %vm3128_vm0, %v3129_v1  ;;  %v1737_v14 = vsel %vm1735_vm12, 0.0, %v1736_v6  ;;  %v1661_v15 = vsel %vm1660_vm11, %v1655_v3, 0.0  ;;  %v2133_v49 = vsel %vm153_vm3, %v2132_v38, %v2131_v40  ;;  %v2121_v6 = vld [vmem:[#allocation8 + $0x3f] sm:$0x1]  ;;  %v2140_v7 = vrot.slane %v2120_v61, 2 }
 0x595   :  { %vm1657_vm13 = vcmp.gt.f32.partialorder %v2486_v10, 0.0  ;;  %2929 = vmatprep.subr.bf16.mxu0 %v3127_v0  ;;  %v1935_v18 = vmul.f32 %v3295_v43, %v1661_v15  ;;  %v2142_v11 = vrot.slane %v2121_v6, 1 }
 0x596   :  { %v2487_v19 = vsel %vm1657_vm13, 1.0, %v3129_v1 }
 0x597   :  { %vm1934_vm14 = vcmp.gt.f32.partialorder %v2487_v19, 0.0 }
 0x598   :  { %2931 = vmatpush3.bf16.msra.mxu0 %v3283_v32  ;;  %v1936_v22 = vsel %vm1934_vm14, 0.0, %v1935_v18 }
 0x599   :  { %2938 = vmatprep.subr.bf16.mxu0 %v3127_v0 }
 0x59b   :  { %2777 = vmatmul.mubr.msk.f32.vlgmr.msra.gmra.mrb[16].mxu0 %vm89_vm1, %v2487_v19 }
 0x59c   :  { %2940 = vmatpush3.bf16.msra.mxu0 %v3265_v4  ;;  %2794 = vmatprep.mubr.msk.f32.mxu0 %vm3128_vm0, %v3129_v1 }
 0x59d   :  { %2947 = vmatprep.subr.bf16.mxu0 %v3127_v0 }
 0x59f   :  { %2795 = vmatmul.mubr.msk.f32.vlgmr.msra.gmra.mrb[18].mxu0 %vm170_vm9, %v1861_v24 }
 0x5a0   :  { %2949 = vmatpush3.bf16.msra.mxu0 %v3287_v35  ;;  %2816 = vmatprep.mubr.msk.f32.mxu0 %vm3128_vm0, %v3129_v1 }
 0x5a1   :  { %2950 = vmatprep.subr.bf16.mxu0 %v3127_v0 }
 0x5a4   :  { %2952 = vmatpush3.bf16.msra.mxu0 %v3316_v12 }
 0x5a5   :  { %2956 = vmatprep.subr.bf16.mxu0 %v3127_v0 }
 0x666   :  { %v1532_v26 = vpop.f32.mrb[14].mxu0 }
 0x667   :  { %v1539_v27 = vadd.f32 %v1538_v54, %v1532_v26  ;;  %v2760_v28 = vpop.f32.mrb[15].mxu0  ;;  %v2135_v54 = vsel %vm156_vm4, %v2134_v45, %v2133_v49 }
 0x668   :  { %v2137_v2 = vsel %vm159_vm5, %v2136_v52, %v2135_v54 }
 0x669   :  { %vm1544_vm15 = vcmp.lt.f32.partialorder %v1539_v27, 1000000.0  ;;  %v2483_v34 = vadd.f32 -1000000.0, %v1539_v27  ;;  %v2139_v10 = vsel %vm162_vm6, %v2138_v62, %v2137_v2 }
 0x66a   :  { %v1545_v36 = vsel %vm1544_vm15, %v1539_v27, 0.0  ;;  %v2141_v15 = vsel %vm165_vm7, %v2140_v7, %v2139_v10 }
 0x66b   :  { %vm1541_vm10 = vcmp.gt.f32.partialorder %v2483_v34, 0.0  ;;  %1547 = vst [vmem:[#allocation16 + $0x20] sm:$0xff] %v1545_v36  ;;  %v1819_v39 = vmul.f32 %v3361_v60, %v1545_v36 }
 0x66c   :  { %v2484_v41 = vsel %vm1541_vm10, 1.0, %v3129_v1 }
 0x66d   :  { %1549 = vst [vmem:[#allocation17 + $0x20] sm:$0xff] %v2484_v41  ;;  %vm1818_vm11 = vcmp.gt.f32.partialorder %v2484_v41, 0.0 }
 0x66e   :  { %v1731_v42 = vpop.f32.mrb[16].mxu0  ;;  %v1820_v46 = vsel %vm1818_vm11, 0.0, %v1819_v39 }
 0x66f   :  { %v1738_v47 = vadd.f32 %v1737_v14, %v1731_v42  ;;  %v2778_v48 = vpop.f32.mrb[17].mxu0 }
 0x671   :  { %v2489_v51 = vadd.f32 -0.3, %v1738_v47  ;;  %vm1743_vm12 = vcmp.lt.f32.partialorder %v1738_v47, 0.3 }
 0x672   :  { %v1930_v53 = vpop.f32.mrb[18].mxu0  ;;  %v1744_v55 = vsel %vm1743_vm12, %v1738_v47, 0.0 }
 0x673   :  { %vm1740_vm2 = vcmp.gt.f32.partialorder %v2489_v51, 0.0  ;;  %v1937_v56 = vadd.f32 %v1936_v22, %v1930_v53  ;;  %v2796_v57 = vpop.f32.mrb[19].mxu0  ;;  %v2018_v58 = vmul.f32 %v3325_v13, %v1744_v55 }
 0x674   :  { %v2490_v59 = vsel %vm1740_vm2, 1.0, %v3129_v1 }
 0x675   :  { %v2495_v63 = vadd.f32 -0.3, %v1937_v56  ;;  %vm1942_vm13 = vcmp.lt.f32.partialorder %v1937_v56, 0.3  ;;  %2788 = vmatmul.mubr.msk.f32.vlgmr.msra.gmra.mrb[16].mxu1 %vm89_vm1, %v2490_v59  ;;  %vm2017_vm3 = vcmp.gt.f32.partialorder %v2490_v59, 0.0 }
 0x676   :  { %2943 = vmatpush3.bf16.msra.mxu1 %v3279_v29  ;;  %2805 = vmatprep.mubr.msk.f32.mxu1 %vm3128_vm0, %v3129_v1  ;;  %v2019_v3 = vsel %vm2017_vm3, 0.0, %v2018_v58  ;;  %v1943_v5 = vsel %vm1942_vm13, %v1937_v56, 0.0 }
 0x677   :  { %vm1939_vm4 = vcmp.gt.f32.partialorder %v2495_v63, 0.0  ;;  %2944 = vmatprep.subr.bf16.mxu1 %v3127_v0  ;;  %v2217_v8 = vmul.f32 %v3295_v43, %v1943_v5  ;;  %v2143_v43 = vsel %vm168_vm8, %v2142_v11, %v2141_v15 }
 0x678   :  { %v2496_v9 = vsel %vm1939_vm4, 1.0, %v3129_v1 }
 0x679   :  { %vm2216_vm5 = vcmp.gt.f32.partialorder %v2496_v9, 0.0 }
 0x67a   :  { %2946 = vmatpush3.bf16.msra.mxu1 %v3283_v32  ;;  %v2218_v14 = vsel %vm2216_vm5, 0.0, %v2217_v8 }
 0x67b   :  { %2953 = vmatprep.subr.bf16.mxu1 %v3127_v0 }
 0x67d   :  { %2806 = vmatmul.mubr.msk.f32.vlgmr.msra.gmra.mrb[18].mxu1 %vm89_vm1, %v2496_v9 }
 0x67e   :  { %2955 = vmatpush3.bf16.msra.mxu1 %v3265_v4  ;;  %2823 = vmatprep.mubr.msk.f32.mxu1 %vm3128_vm0, %v3129_v1 }
 0x67f   :  { %2962 = vmatprep.subr.bf16.mxu1 %v3127_v0 }
 0x681   :  { %2824 = vmatmul.mubr.msk.f32.vlgmr.msra.gmra.mrb[20].mxu1 %vm170_vm9, %v2143_v43 }
 0x682   :  { %2964 = vmatpush3.bf16.msra.mxu1 %v3287_v35  ;;  %2845 = vmatprep.mubr.msk.f32.mxu1 %vm3128_vm0, %v3129_v1 }
 0x683   :  { %2965 = vmatprep.subr.bf16.mxu1 %v3127_v0 }
 0x686   :  { %2967 = vmatpush3.bf16.msra.mxu1 %v3316_v12 }
 0x748   :  { %v1814_v16 = vpop.f32.mrb[16].mxu1 }
 0x749   :  { %v1821_v4 = vadd.f32 %v1820_v46, %v1814_v16  ;;  %v2789_v17 = vpop.f32.mrb[17].mxu1 }
 0x74b   :  { %vm1826_vm6 = vcmp.lt.f32.partialorder %v1821_v4, 1000000.0  ;;  %v2492_v18 = vadd.f32 -1000000.0, %v1821_v4 }
 0x74c   :  { %v1827_v19 = vsel %vm1826_vm6, %v1821_v4, 0.0 }
 0x74d   :  { %vm1823_vm7 = vcmp.gt.f32.partialorder %v2492_v18, 0.0  ;;  %1829 = vst [vmem:[#allocation16 + $0x28] sm:$0xff] %v1827_v19  ;;  %v2101_v20 = vmul.f32 %v3361_v60, %v1827_v19 }
 0x74e   :  { %v2493_v21 = vsel %vm1823_vm7, 1.0, %v3129_v1 }
 0x74f   :  { %1831 = vst [vmem:[#allocation17 + $0x28] sm:$0xff] %v2493_v21  ;;  %vm2100_vm8 = vcmp.gt.f32.partialorder %v2493_v21, 0.0 }
 0x750   :  { %v2013_v35 = vpop.f32.mrb[18].mxu1  ;;  %v2102_v22 = vsel %vm2100_vm8, 0.0, %v2101_v20 }
 0x751   :  { %v2020_v23 = vadd.f32 %v2019_v3, %v2013_v35  ;;  %v2807_v24 = vpop.f32.mrb[19].mxu1 }
 0x753   :  { %v2498_v25 = vadd.f32 -0.3, %v2020_v23  ;;  %vm2025_vm9 = vcmp.lt.f32.partialorder %v2020_v23, 0.3 }
 0x754   :  { %v2212_v12 = vpop.f32.mrb[20].mxu1  ;;  %v2026_v26 = vsel %vm2025_vm9, %v2020_v23, 0.0 }
 0x755   :  { %vm2022_vm14 = vcmp.gt.f32.partialorder %v2498_v25, 0.0  ;;  %v2219_v27 = vadd.f32 %v2218_v14, %v2212_v12  ;;  %v2825_v28 = vpop.f32.mrb[21].mxu1  ;;  %v2300_v30 = vmul.f32 %v3325_v13, %v2026_v26 }
 0x756   :  { %v2499_v31 = vsel %vm2022_vm14, 1.0, %v3129_v1 }
 0x757   :  { %v2504_v33 = vadd.f32 -0.3, %v2219_v27  ;;  %vm2224_vm15 = vcmp.lt.f32.partialorder %v2219_v27, 0.3  ;;  %2817 = vmatmul.mubr.msk.f32.vlgmr.msra.gmra.mrb[20].mxu0 %vm89_vm1, %v2499_v31  ;;  %vm2299_vm10 = vcmp.gt.f32.partialorder %v2499_v31, 0.0 }
 0x758   :  { %v2225_v34 = vsel %vm2224_vm15, %v2219_v27, 0.0  ;;  %2958 = vmatpush3.bf16.msra.mxu0 %v3279_v29  ;;  %2834 = vmatprep.mubr.msk.f32.mxu0 %vm3128_vm0, %v3129_v1  ;;  %v2301_v36 = vsel %vm2299_vm10, 0.0, %v2300_v30 }
 0x759   :  { %vm2221_vm11 = vcmp.gt.f32.partialorder %v2504_v33, 0.0  ;;  %2396 = vst.msk [vmem:[#allocation2] sm:$0xff] %vm89_vm1, %v2225_v34  ;;  %2959 = vmatprep.subr.bf16.mxu0 %v3127_v0 }
 0x75a   :  { %v2505_v13 = vsel %vm2221_vm11, 1.0, %v3129_v1 }
 0x75b   :  { %2397 = vst.msk [vmem:[#allocation3] sm:$0xff] %vm89_vm1, %v2505_v13 }
 0x75c   :  { %2961 = vmatpush3.bf16.msra.mxu0 %v3283_v32 }
 0x75f   :  { %2835 = vmatmul.mubr.msk.f32.vlgmr.msra.gmra.mrb[22].mxu0 %vm89_vm1, %v2505_v13 }
 0x82a   :  { %v2096_v37 = vpop.f32.mrb[20].mxu0 }
 0x82b   :  { %v2103_v38 = vadd.f32 %v2102_v22, %v2096_v37  ;;  %v2818_v29 = vpop.f32.mrb[21].mxu0 }
 0x82d   :  { %vm2108_vm12 = vcmp.lt.f32.partialorder %v2103_v38, 1000000.0  ;;  %v2501_v39 = vadd.f32 -1000000.0, %v2103_v38 }
 0x82e   :  { %v2109_v40 = vsel %vm2108_vm12, %v2103_v38, 0.0 }
 0x82f   :  { %vm2105_vm0 = vcmp.gt.f32.partialorder %v2501_v39, 0.0  ;;  %2111 = vst [vmem:[#allocation16 + $0x30] sm:$0xff] %v2109_v40  ;;  %v2383_v41 = vmul.f32 %v3361_v60, %v2109_v40 }
 0x830   :  { %v2502_v0 = vsel %vm2105_vm0, 1.0, %v3129_v1 }
 0x831   :  { %2113 = vst [vmem:[#allocation17 + $0x30] sm:$0xff] %v2502_v0  ;;  %vm2382_vm2 = vcmp.gt.f32.partialorder %v2502_v0, 0.0 }
 0x832   :  { %v2295_v42 = vpop.f32.mrb[22].mxu0  ;;  %v2384_v44 = vsel %vm2382_vm2, 0.0, %v2383_v41 }
 0x833   :  { %v2302_v45 = vadd.f32 %v2301_v36, %v2295_v42  ;;  %v2836_v32 = vpop.f32.mrb[23].mxu0 }
 0x835   :  { %v2507_v46 = vadd.f32 -0.3, %v2302_v45  ;;  %vm2307_vm13 = vcmp.lt.f32.partialorder %v2302_v45, 0.3 }
 0x836   :  { %v2308_v47 = vsel %vm2307_vm13, %v2302_v45, 0.0 }
 0x837   :  { %vm2304_vm3 = vcmp.gt.f32.partialorder %v2507_v46, 0.0  ;;  %2398 = vst.msk [vmem:[#allocation4] sm:$0xff] %vm89_vm1, %v2308_v47 }
 0x838   :  { %v2508_v48 = vsel %vm2304_vm3, 1.0, %v3129_v1 }
 0x839   :  { %2846 = vmatmul.mubr.msk.f32.vlgmr.msra.gmra.mrb[22].mxu1 %vm89_vm1, %v2508_v48  ;;  %2399 = vst.msk [vmem:[#allocation5] sm:$0xff] %vm89_vm1, %v2508_v48 }
 0x90c   :  { %v2378_v60 = vpop.f32.mrb[22].mxu1 }
 0x90d   :  { %v2385_v49 = vadd.f32 %v2384_v44, %v2378_v60  ;;  %v2847_v50 = vpop.f32.mrb[23].mxu1 }
 0x90f   :  { %v2510_v51 = vadd.f32 -1000000.0, %v2385_v49  ;;  %vm2390_vm4 = vcmp.lt.f32.partialorder %v2385_v49, 1000000.0 }
 0x910   :  { %v2391_v52 = vsel %vm2390_vm4, %v2385_v49, 0.0 }
 0x911   :  { %vm2387_vm5 = vcmp.gt.f32.partialorder %v2510_v51, 0.0  ;;  %2393 = vst [vmem:[#allocation16 + $0x38] sm:$0xff] %v2391_v52 }
 0x912   :  { %v2511_v53 = vsel %vm2387_vm5, 1.0, %v3129_v1 }
 0x913   :  { %3078 = shalt.err (!%p3075_p8)
}
 0x914   :  { %s3079_s21 = scalar_lea.hbm %s3588_s7, 1024 }
 0x915   :  { %p3080_p9 = scmp.ne.s32.totalorder %s3588_s7, %s3079_s21  ;;  %p3083_p10 = scmp.lt.u32.totalorder %s3079_s21, %s3588_s7 }
 0x917   :  { %p3085_p11 = pnand %p3083_p10, %p3080_p9 }
 0x919   :  { %3088 = shalt.err (!%p3085_p11)
}
 0x91a   :  { %2413 = dma.vmem_to_hbm [thread:$0]  %s2408_s13, 1024, %s3588_s7, [#allocation10], %s3123_s17, %s3123_s17, %s3124_s18   ;;  %2395 = vst [vmem:[#allocation17 + $0x38] sm:$0xff] %v2511_v53 }
 0x91b   :  { %s3089_s26 = scalar_lea.vmem %s3543_s15, 1024  ;;  %p3094_p13 = scmp.lt.s32.totalorder %s3543_s15, %s3543_s15 }
 0x91c   :  { %p3090_p12 = scmp.ne.s32.totalorder %s3543_s15, %s3089_s26  ;;  %p3095_p0 = scmp.lt.s32.totalorder %s3089_s26, %s3089_s26 }
 0x91e   :  { %p3096_p1 = por %p3095_p0, %p3094_p13 }
 0x920   :  { %p3097_p2 = pnand %p3096_p1, %p3090_p12 }
 0x922   :  { %3100 = shalt.err (!%p3097_p2)
}
 0x923   :  { %s3101_s1 = scalar_lea.hbm %s3589_s8, 1024 }
 0x924   :  { %p3102_p3 = scmp.ne.s32.totalorder %s3589_s8, %s3101_s1  ;;  %p3105_p4 = scmp.lt.u32.totalorder %s3101_s1, %s3589_s8 }
 0x926   :  { %p3107_p5 = pnand %p3105_p4, %p3102_p3 }
 0x928   :  { %3110 = shalt.err (!%p3107_p5)
}
 0x929   :  { %2425 = dma.vmem_to_hbm [thread:$0]  %s3543_s15, 1024, %s3589_s8, [#allocation18], %s3123_s17, %s3123_s17, %s3124_s18  }
 0x92a   :  { %3117 = dma.done.wait [#allocation10], 1024  }
 0x92b   :  { %3118 = vsyncadd [#allocation10], 4294966272 }
 0x92c   :  { %3119 = dma.done.wait [#allocation18], 1024  }
 0x92d   :  { %3120 = vsyncadd [#allocation18], 4294966272 }
 0x92e   :  { %2432 = vsyncpa [#allocation9], 1 }
 0x92f   :  { %2433 = vsyncpa [#allocation12], 1 }
 0x930   :  { %2434 = vsyncpa [#allocation15], 1 }
 0x931   :  { %2435 = vsyncpa [#allocation10], 1 }
 0x932   :  { %2436 = vsyncpa [#allocation18], 1 }

</bundles_post_ra>
